<compile_context>
chip_gen: v6e
topology: v6e:2x2x1
jax: 0.10.0
libtpu: 0.0.40
codegen_flags: <defaults>
</compile_context>

<pallas_src>
import jax
import jax.numpy as jnp
from jax.experimental import pallas as pl
from jax.experimental.pallas import tpu as pltpu


COMPUTE_DTYPE = jnp.bfloat16   # MXU input dtype; accumulation stays f32


def _ffnn_kernel(x_ref,
                 w1_ref, c1_ref,
                 w2_ref, c2_ref,
                 w3_ref, c3_ref,
                 o_ref):
    x = x_ref[...]                                   # (bm, F_in) bf16

    # fc1 (+ fused bias/BatchNorm) + ReLU    (dropout = identity in eval)
    h1 = jnp.dot(x, w1_ref[...], preferred_element_type=jnp.float32)
    h1 = jnp.maximum(h1 + c1_ref[...], 0.0)          # f32 epilogue
    h1 = h1.astype(COMPUTE_DTYPE)

    # fc2 (+ fused bias/BatchNorm) + ReLU    (dropout = identity in eval)
    h2 = jnp.dot(h1, w2_ref[...], preferred_element_type=jnp.float32)
    h2 = jnp.maximum(h2 + c2_ref[...], 0.0)
    h2 = h2.astype(COMPUTE_DTYPE)

    # fc3 (output columns are zero-padded to a multiple of 128 lanes)
    out = jnp.dot(h2, w3_ref[...], preferred_element_type=jnp.float32)
    o_ref[...] = (out + c3_ref[...]).astype(o_ref.dtype)


def _round_up(n, m):
    return ((n + m - 1) // m) * m


def fuse_params(p):
    """Fold Linear bias + eval-mode BatchNorm into the weights, pad the output
    layer to a lane-dense (multiple-of-128) width, and cast matmul inputs to
    bf16.  One-time wrapper-side transform; mathematically exact in f32."""
    w1f = (p["w1"] * p["s1"]).astype(COMPUTE_DTYPE)
    c1 = (p["b1"] * p["s1"] + p["t1"]).astype(jnp.float32)
    w2f = (p["w2"] * p["s2"]).astype(COMPUTE_DTYPE)
    c2 = (p["b2"] * p["s2"] + p["t2"]).astype(jnp.float32)

    F_out = p["w3"].shape[1]
    F_pad = _round_up(F_out, 128)
    w3f = jnp.pad(p["w3"], ((0, 0), (0, F_pad - F_out))).astype(COMPUTE_DTYPE)
    c3 = jnp.pad(p["b3"], ((0, 0), (0, F_pad - F_out))).astype(jnp.float32)

    return dict(w1=w1f, c1=c1, w2=w2f, c2=c2, w3=w3f, c3=c3,
                f_out=F_out, f_pad=F_pad)


def ffnn_forward(x, fused, *, bm=128):
    """x: (B, F_in) float.  fused: output of fuse_params.  Returns (B, F_out) f32."""
    B, F_in = x.shape
    H1 = fused["w1"].shape[1]
    H2 = fused["w2"].shape[1]
    F_pad = fused["f_pad"]
    F_out = fused["f_out"]

    # Pad the batch to a multiple of the batch tile (zeros are harmless).
    B_pad = _round_up(B, bm)
    if B_pad != B:
        x = jnp.pad(x, ((0, B_pad - B), (0, 0)))
    x = x.astype(COMPUTE_DTYPE)

    grid = (B_pad // bm,)

    def const_spec(shape):
        # Full-array block (weights / fused bias rows); same block every step,
        # so the pipeline only DMAs it once.
        return pl.BlockSpec(shape, lambda i: tuple(0 for _ in shape))

    in_specs = [
        pl.BlockSpec((bm, F_in), lambda i: (i, 0)),        # x, tiled over batch
        const_spec((F_in, H1)), const_spec((1, H1)),
        const_spec((H1, H2)),   const_spec((1, H2)),
        const_spec((H2, F_pad)), const_spec((1, F_pad)),
    ]
    out_spec = pl.BlockSpec((bm, F_pad), lambda i: (i, 0))  # lane-dense output

    out = pl.pallas_call(
        _ffnn_kernel,
        out_shape=jax.ShapeDtypeStruct((B_pad, F_pad), jnp.float32),
        grid_spec=pltpu.PrefetchScalarGridSpec(
            num_scalar_prefetch=0,
            grid=grid,
            in_specs=in_specs,
            out_specs=out_spec,
        ),
        compiler_params=pltpu.CompilerParams(
            dimension_semantics=("parallel",),   # batch axis shards across TCs
        ),
    )(x,
      fused["w1"], fused["c1"],
      fused["w2"], fused["c2"],
      fused["w3"], fused["c3"])

    return out[:B, :F_out]


def make_params(key, input_size, hidden_size, hidden_size2, output_size):
    """Deterministic synthetic parameters matching nn.Linear / BatchNorm1d.

    BatchNorm1d (eval):  y = (h - mean)/sqrt(var+eps) * gamma + beta
                           = h * s + t,   s = gamma/sqrt(var+eps),
                                          t = beta - mean*s.
    """
    ks = jax.random.split(key, 12)
    eps = 1e-5

    def linear(kw, kb, fan_in, fan_out):
        bound = 1.0 / jnp.sqrt(fan_in)
        w = jax.random.uniform(kw, (fan_in, fan_out), jnp.float32, -bound, bound)
        b = jax.random.uniform(kb, (1, fan_out), jnp.float32, -bound, bound)
        return w, b

    def bn(kg, kb, km, kv, n):
        gamma = 1.0 + 0.1 * jax.random.normal(kg, (1, n), jnp.float32)
        beta = 0.1 * jax.random.normal(kb, (1, n), jnp.float32)
        mean = 0.1 * jax.random.normal(km, (1, n), jnp.float32)
        var = jnp.abs(jax.random.normal(kv, (1, n), jnp.float32)) + 0.5
        s = gamma / jnp.sqrt(var + eps)
        t = beta - mean * s
        return s, t

    w1, b1 = linear(ks[0], ks[1], input_size, hidden_size)
    s1, t1 = bn(ks[2], ks[3], ks[4], ks[5], hidden_size)
    w2, b2 = linear(ks[6], ks[7], hidden_size, hidden_size2)
    s2, t2 = bn(ks[8], ks[9], ks[10], ks[11], hidden_size2)
    kw3, kb3 = jax.random.split(jax.random.fold_in(key, 99))
    w3, b3 = linear(kw3, kb3, hidden_size2, output_size)

    return dict(w1=w1, b1=b1, s1=s1, t1=t1,
                w2=w2, b2=b2, s2=s2, t2=t2,
                w3=w3, b3=b3)


def ffnn_reference(x, fused):
    """Pure-JAX reference with the same fused params and bf16 matmul inputs."""
    xf = x.astype(COMPUTE_DTYPE).astype(jnp.float32)
    w1 = fused["w1"].astype(jnp.float32)
    w2 = fused["w2"].astype(jnp.float32)
    w3 = fused["w3"].astype(jnp.float32)
    h1 = jnp.maximum(xf @ w1 + fused["c1"], 0.0)
    h1 = h1.astype(COMPUTE_DTYPE).astype(jnp.float32)
    h2 = jnp.maximum(h1 @ w2 + fused["c2"], 0.0)
    h2 = h2.astype(COMPUTE_DTYPE).astype(jnp.float32)
    out = h2 @ w3 + fused["c3"]
    return out[:, :fused["f_out"]]


if __name__ == "__main__":
    # Small shapes consistent with the module (TF-IDF features -> class logits),
    # sized so the batch tile is 128 and the grid has 2 parallel steps.
    batch = 256
    input_size = 512      # stands in for X_train_sparse.shape[1]
    hidden_size = 256
    hidden_size2 = 256
    output_size = 20      # stands in for len(target_names)

    key = jax.random.PRNGKey(0)
    kx, kp = jax.random.split(key)

    # Sparse-ish dense input (most entries zero), like a TF-IDF row batch.
    dense = jax.random.uniform(kx, (batch, input_size), jnp.float32)
    mask = jax.random.bernoulli(jax.random.fold_in(kx, 1), 0.05,
                                (batch, input_size))
    x = jnp.where(mask, dense, 0.0)

    params = make_params(kp, input_size, hidden_size, hidden_size2, output_size)
    fused = fuse_params(params)

    out = ffnn_forward(x, fused, bm=128)
    out = jax.block_until_ready(out)

    ref = ffnn_reference(x, fused)
    assert out.shape == (batch, output_size)
    assert jnp.allclose(out, ref, atol=1e-2, rtol=1e-2)

    print("KERNEL_OK")
</pallas_src>

<mosaic_0001>
module attributes {stable_mosaic.version = 11 : i64} {
  func.func @_ffnn_kernel(%arg0: i32, %arg1: memref<128x512xbf16, #tpu.memory_space<vmem>>, %arg2: memref<512x256xbf16, #tpu.memory_space<vmem>>, %arg3: memref<1x256xf32, #tpu.memory_space<vmem>>, %arg4: memref<256x256xbf16, #tpu.memory_space<vmem>>, %arg5: memref<1x256xf32, #tpu.memory_space<vmem>>, %arg6: memref<256x128xbf16, #tpu.memory_space<vmem>>, %arg7: memref<1x128xf32, #tpu.memory_space<vmem>>, %arg8: memref<128x128xf32, #tpu.memory_space<vmem>>) attributes {dimension_semantics = [#tpu.dimension_semantics<parallel>], iteration_bounds = array<i64: 2>, scalar_prefetch = 0 : i64, scratch_operands = 0 : i64, tpu.core_type = #tpu.core_type<tc>, window_params = [{transform_indices = @transform_0, window_bounds = array<i64: 128, 512>}, {pipeline_mode = #tpu.pipeline_mode<synchronous>, transform_indices = @transform_1, window_bounds = array<i64: 512, 256>}, {pipeline_mode = #tpu.pipeline_mode<synchronous>, transform_indices = @transform_2, window_bounds = array<i64: 1, 256>}, {pipeline_mode = #tpu.pipeline_mode<synchronous>, transform_indices = @transform_3, window_bounds = array<i64: 256, 256>}, {pipeline_mode = #tpu.pipeline_mode<synchronous>, transform_indices = @transform_4, window_bounds = array<i64: 1, 256>}, {pipeline_mode = #tpu.pipeline_mode<synchronous>, transform_indices = @transform_5, window_bounds = array<i64: 256, 128>}, {pipeline_mode = #tpu.pipeline_mode<synchronous>, transform_indices = @transform_6, window_bounds = array<i64: 1, 128>}, {transform_indices = @transform_7, window_bounds = array<i64: 128, 128>}]} {
    %c0 = arith.constant 0 : index
    %c0_0 = arith.constant 0 : index
    %0 = vector.load %arg1[%c0, %c0_0] : memref<128x512xbf16, #tpu.memory_space<vmem>>, vector<128x512xbf16>
    %c0_1 = arith.constant 0 : index
    %c0_2 = arith.constant 0 : index
    %1 = vector.load %arg2[%c0_1, %c0_2] : memref<512x256xbf16, #tpu.memory_space<vmem>>, vector<512x256xbf16>
    %cst = arith.constant dense<0.000000e+00> : vector<128x256xf32>
    %2 = tpu.matmul %0, %1, %cst {dimension_numbers = #tpu.dot_dimension_numbers<[1], [0], [0], [1], [0, 0, 1, 1], [], []>} : vector<128x512xbf16>, vector<512x256xbf16>, vector<128x256xf32> -> vector<128x256xf32>
    %c0_3 = arith.constant 0 : index
    %c0_4 = arith.constant 0 : index
    %3 = vector.load %arg3[%c0_3, %c0_4] : memref<1x256xf32, #tpu.memory_space<vmem>>, vector<1x256xf32>
    %4 = vector.broadcast %3 : vector<1x256xf32> to vector<128x256xf32>
    %5 = arith.addf %2, %4 : vector<128x256xf32>
    %cst_5 = arith.constant 0.000000e+00 : f32
    %6 = vector.broadcast %cst_5 : f32 to vector<128x256xf32>
    %7 = arith.maximumf %5, %6 : vector<128x256xf32>
    %8 = arith.truncf %7 : vector<128x256xf32> to vector<128x256xbf16>
    %c0_6 = arith.constant 0 : index
    %c0_7 = arith.constant 0 : index
    %9 = vector.load %arg4[%c0_6, %c0_7] : memref<256x256xbf16, #tpu.memory_space<vmem>>, vector<256x256xbf16>
    %cst_8 = arith.constant dense<0.000000e+00> : vector<128x256xf32>
    %10 = tpu.matmul %8, %9, %cst_8 {dimension_numbers = #tpu.dot_dimension_numbers<[1], [0], [0], [1], [0, 0, 1, 1], [], []>} : vector<128x256xbf16>, vector<256x256xbf16>, vector<128x256xf32> -> vector<128x256xf32>
    %c0_9 = arith.constant 0 : index
    %c0_10 = arith.constant 0 : index
    %11 = vector.load %arg5[%c0_9, %c0_10] : memref<1x256xf32, #tpu.memory_space<vmem>>, vector<1x256xf32>
    %12 = vector.broadcast %11 : vector<1x256xf32> to vector<128x256xf32>
    %13 = arith.addf %10, %12 : vector<128x256xf32>
    %cst_11 = arith.constant 0.000000e+00 : f32
    %14 = vector.broadcast %cst_11 : f32 to vector<128x256xf32>
    %15 = arith.maximumf %13, %14 : vector<128x256xf32>
    %16 = arith.truncf %15 : vector<128x256xf32> to vector<128x256xbf16>
    %c0_12 = arith.constant 0 : index
    %c0_13 = arith.constant 0 : index
    %17 = vector.load %arg6[%c0_12, %c0_13] : memref<256x128xbf16, #tpu.memory_space<vmem>>, vector<256x128xbf16>
    %cst_14 = arith.constant dense<0.000000e+00> : vector<128x128xf32>
    %18 = tpu.matmul %16, %17, %cst_14 {dimension_numbers = #tpu.dot_dimension_numbers<[1], [0], [0], [1], [0, 0, 1, 1], [], []>} : vector<128x256xbf16>, vector<256x128xbf16>, vector<128x128xf32> -> vector<128x128xf32>
    %c0_15 = arith.constant 0 : index
    %c0_16 = arith.constant 0 : index
    %19 = vector.load %arg7[%c0_15, %c0_16] : memref<1x128xf32, #tpu.memory_space<vmem>>, vector<1x128xf32>
    %20 = vector.broadcast %19 : vector<1x128xf32> to vector<128x128xf32>
    %21 = arith.addf %18, %20 : vector<128x128xf32>
    %c0_17 = arith.constant 0 : index
    %c0_18 = arith.constant 0 : index
    %22 = vector.load %arg8[%c0_17, %c0_18] : memref<128x128xf32, #tpu.memory_space<vmem>>, vector<128x128xf32>
    tpu.vector_store %arg8[%c0_17, %c0_18], %21 {strides = array<i32>} : memref<128x128xf32, #tpu.memory_space<vmem>>, vector<128x128xf32>,
    return
  }
  func.func @transform_0(%arg0: i32) -> (i32, i32) {
    %c0_i32 = arith.constant 0 : i32
    %c0_i32_0 = arith.constant 0 : i32
    return %arg0, %c0_i32 : i32, i32
  }
  func.func @transform_1(%arg0: i32) -> (i32, i32) {
    %c0_i32 = arith.constant 0 : i32
    %c0_i32_0 = arith.constant 0 : i32
    %c0_i32_1 = arith.constant 0 : i32
    return %c0_i32, %c0_i32_0 : i32, i32
  }
  func.func @transform_2(%arg0: i32) -> (i32, i32) {
    %c0_i32 = arith.constant 0 : i32
    %c0_i32_0 = arith.constant 0 : i32
    %c0_i32_1 = arith.constant 0 : i32
    return %c0_i32, %c0_i32_0 : i32, i32
  }
  func.func @transform_3(%arg0: i32) -> (i32, i32) {
    %c0_i32 = arith.constant 0 : i32
    %c0_i32_0 = arith.constant 0 : i32
    %c0_i32_1 = arith.constant 0 : i32
    return %c0_i32, %c0_i32_0 : i32, i32
  }
  func.func @transform_4(%arg0: i32) -> (i32, i32) {
    %c0_i32 = arith.constant 0 : i32
    %c0_i32_0 = arith.constant 0 : i32
    %c0_i32_1 = arith.constant 0 : i32
    return %c0_i32, %c0_i32_0 : i32, i32
  }
  func.func @transform_5(%arg0: i32) -> (i32, i32) {
    %c0_i32 = arith.constant 0 : i32
    %c0_i32_0 = arith.constant 0 : i32
    %c0_i32_1 = arith.constant 0 : i32
    return %c0_i32, %c0_i32_0 : i32, i32
  }
  func.func @transform_6(%arg0: i32) -> (i32, i32) {
    %c0_i32 = arith.constant 0 : i32
    %c0_i32_0 = arith.constant 0 : i32
    %c0_i32_1 = arith.constant 0 : i32
    return %c0_i32, %c0_i32_0 : i32, i32
  }
  func.func @transform_7(%arg0: i32) -> (i32, i32) {
    %c0_i32 = arith.constant 0 : i32
    %c0_i32_0 = arith.constant 0 : i32
    return %arg0, %c0_i32 : i32, i32
  }
}

</mosaic_0001>

<bundles_post_ra>
// kernel: tpu_custom_call.1
= control target key start
LH: loop header
LB: loop body
LE: loop exit
PB: predicated region body
PF: predicated region fallthrough
CT: control target
= control target key end

     0   :  { %s3060_s0 = inlined_call_operand.hbm [shape: bf16[256,512], index: 0, kind: input, shape index: {}]   ;;  %s3061_s1 = inlined_call_operand.hbm [shape: bf16[512,256], index: 1, kind: input, shape index: {}]   ;;  %s3062_s2 = inlined_call_operand.vmem [shape: f32[1,256], index: 2, kind: input, shape index: {}]   ;;  %s3063_s3 = inlined_call_operand.hbm [shape: bf16[256,256], index: 3, kind: input, shape index: {}]   ;;  %s3064_s4 = inlined_call_operand.vmem [shape: f32[1,256], index: 4, kind: input, shape index: {}]   ;;  %s3065_s5 = inlined_call_operand.hbm [shape: bf16[256,128], index: 5, kind: input, shape index: {}]   ;;  %s3066_s6 = inlined_call_operand.vmem [shape: f32[1,128], index: 6, kind: input, shape index: {}]   ;;  %s3067_s7 = inlined_call_operand.hbm [shape: f32[256,128], index: 7, kind: output, shape index: {}]  }
   0x1   :  { %3072 = sst [smem:[#allocation15_spill]] %s3061_s1 }
   0x2   :  { %12 = vsyncpa [#allocation3], 0 }
   0x3   :  { %14 = vsyncpa [#allocation3 + $0x1], 0 }
   0x4   :  { %15 = vsyncpa [#allocation6], 0 }
   0x5   :  { %16 = vsyncpa [#allocation9], 0 }
   0x6   :  { %17 = vsyncpa [#allocation4], 0 }
   0x7   :  { %19 = vsyncpa [#allocation4 + $0x1], 0  ;;  %s2695_s24 = smov 0   ;;  %s2697_s25 = smov 0  }
   0x8   :  { %s2699_s26 = smov 0   ;;  %s2701_s27 = smov 0  }
   0x9 LB: > { %s2716_s28 = sadd.s32 4294967295, %s2640_s27   ;;  %s1936_s29 = sadd.s32 4294967294, %s2640_s27   ;;  %s2640_s27 = sphi %s2701_s27, %s3093_s27   ;;  %s2636_s26 = sphi %s2699_s26, %s3092_s26   ;;  %s2632_s25 = sphi %s2697_s25, %s3091_s25   ;;  %s2628_s24 = sphi %s2695_s24, %s3090_s24  }
   0xa   : > { %p45_p0 = scmp.ne.s32.totalorder %s2632_s25, %s2628_s24  ;;  %p3068_p1 = scmp.eq.s32.totalorder %s2716_s28, 0 }
   0xb   : > { %p201_p3 = scmp.eq.s32.totalorder %s1936_s29, 1  ;;  %p1937_p5 = scmp.ge.s32.totalorder %s2640_s27, 1 }
   0xc   : > { %p2725_p4 = por %p3068_p1, %p45_p0  ;;  %p208_p7 = scmp.lt.s32.totalorder %s2640_s27, 3 }
   0xd   : > { %p2730_p6 = por %p201_p3, %p45_p0  ;;  %s2642_s10 = smov [#allocation5]  }
   0xe   : > { %s3073_s30 = scalar_select %p2725_p4, 1, 0 }
   0xf   : > { %s3074_s8 = scalar_select %p2730_p6, 1, 0 }
  0x10   : > { %p2735_p8 = pnand %p1937_p5, %p208_p7  ;;  %s220_s11 = sshll.u32 %s2642_s10, 4  ;;  %s221_s11 = int_to_ptr.vmem [resolvable:$true] %s220_s11 }
  0x11   : > { %s2643_s13 = smov [#allocation7]   ;;  %s2644_s15 = smov [#allocation8]  }
  0x12   : > { %s3075_s9 = scalar_select %p2735_p8, 1, 0 }
  0x13   : > { %p2185_p9 = pneg %p2735_p8  ;;  %s236_s14 = sshll.u32 %s2643_s13, 4  ;;  %s237_s14 = int_to_ptr.vmem [resolvable:$true] %s236_s14 }
  0x14   : > { %s252_s16 = sshll.u32 %s2644_s15, 4  ;;  %s2473_s17 = scalar_lea.vmem %s221_s11, 8192  ;;  %s253_s16 = int_to_ptr.vmem [resolvable:$true] %s252_s16 }
  0x15   : > { %p2744_p11 = pnand %p2185_p9, %p3068_p1  ;;  %p2474_p13 = scmp.ne.s32.totalorder %s221_s11, %s2473_s17 }
  0x16   : > { %p2481_p5 = scmp.lt.s32.totalorder %s221_s11, %s221_s11  ;;  %p2482_p7 = scmp.lt.s32.totalorder %s2473_s17, %s2473_s17 }
  0x17   : > { %p2464_p12 = pneg %p2744_p11 }
  0x18   : > { %p2483_p9 = por %p2482_p7, %p2481_p5 }
  0x19   : > { %p2476_p0 = pnand %p2474_p13, %p2464_p12 }
  0x1b   : > { %p2477_p3 = pneg %p2476_p0 }
  0x1d   : > { %p2484_p10 = pnand %p2483_p9, %p2477_p3 }
  0x1f   : > { %2487 = shalt.err (!%p2484_p10)
}
  0x20   : > { %s2645_s18 = smov 128   ;;  %s2646_s19 = smov 8  }
  0x21   : > { %s3077_s1 = sld [smem:[#allocation15_spill]]  ;;  %s2499_s22 = scalar_lea.vmem %s237_s14, 4096 }
  0x22   : > { %p2500_p1 = scmp.ne.s32.totalorder %s237_s14, %s2499_s22  ;;  %p2507_p2 = scmp.lt.s32.totalorder %s237_s14, %s237_s14 }
  0x23   : > { %p2508_p6 = scmp.lt.s32.totalorder %s2499_s22, %s2499_s22 }
  0x24   : > { %p2502_p13 = pnand %p2500_p1, %p2464_p12 }
  0x25   : > { %p2509_p5 = por %p2508_p6, %p2507_p2 }
  0x26   : > { %p2503_p0 = pneg %p2502_p13 }
  0x27   : > { %2188 = dma.hbm_to_vmem [thread:$0]  (!%p2744_p11), %s3077_s1, 8192, %s221_s11, [#allocation6], %s2645_s18, %s2645_s18, %s2646_s19  }
  0x28   : > { %p2510_p3 = pnand %p2509_p5, %p2503_p0 }
  0x2a   : > { %2513 = shalt.err (!%p2510_p3)
}
  0x2b   : > { %2191 = dma.hbm_to_vmem [thread:$0]  (!%p2744_p11), %s3063_s3, 4096, %s237_s14, [#allocation6], %s2645_s18, %s2645_s18, %s2646_s19  }
  0x2c   : > { %s2525_s10 = scalar_lea.vmem %s253_s16, 2048  ;;  %p2533_p9 = scmp.lt.s32.totalorder %s253_s16, %s253_s16 }
  0x2d   : > { %p2526_p10 = scmp.ne.s32.totalorder %s253_s16, %s2525_s10  ;;  %p2534_p13 = scmp.lt.s32.totalorder %s2525_s10, %s2525_s10 }
  0x2f   : > { %p2528_p7 = pnand %p2526_p10, %p2464_p12  ;;  %p2535_p4 = por %p2534_p13, %p2533_p9 }
  0x31   : > { %p2529_p1 = pneg %p2528_p7 }
  0x33   : > { %p2536_p2 = pnand %p2535_p4, %p2529_p1 }
  0x35   : > { %2539 = shalt.err (!%p2536_p2)
}
  0x36   : > { %s2647_s11 = smov 64   ;;  %s2648_s13 = smov 4  }
  0x37   : > { %2194 = dma.hbm_to_vmem [thread:$0]  (!%p2744_p11), %s3065_s5, 2048, %s253_s16, [#allocation9], %s2647_s11, %s2647_s11, %s2648_s13  }
  0x38   : > { %s2775_s17 = sadd.s32 1, %s2640_s27   ;;  %s32_s19 = sadd.s32 1, %s2636_s26 }
  0x39   : > { %s29_s18 = ssub.s32 %s2640_s27, %s2775_s17  ;;  %p39_p6 = scmp.ne.s32.totalorder %s2636_s26, %s2632_s25 }
  0x3a   : > { %p30_p4 = scmp.eq.s32.totalorder %s29_s18, 0  ;;  %p40_p12 = scmp.eq.s32.totalorder %s2640_s27, 0 }
  0x3b   : > { %p2206_p0 = scmp.lt.s32.totalorder %s2640_s27, 2  ;;  %p3078_p3 = scmp.eq.s32.totalorder %s2716_s28, 1 }
  0x3c   : > { %s2785_s20 = scalar_select %p30_p4, %s2636_s26, %s32_s19  }
  0x3d   : > { %p41_p5 = por %p40_p12, %p39_p6  ;;  %p2789_p10 = por %p3078_p3, %p39_p6 }
  0x3e   : > { %s269_s12 = sand.u32 1, %s2636_s26   ;;  %s2103_s22 = sshll.u32 %s2640_s27, 12 }
  0x3f   : > { %s3079_s21 = scalar_select %p2789_p10, 1, 0 }
  0x40   : > { %s1942_s16 = sshll.u32 %s269_s12, 8  ;;  %s2798_s10 = scalar_lea.hbm %s3060_s0, %s2103_s22 }
  0x41   : > { %s273_s11 = scalar_lea.vmem [#allocation2], %s1942_s16  ;;  %p2800_p11 = pnand %p2206_p0, %p41_p5 }
  0x42   : > { %s281_s13 = sshll.u32 %s273_s11, 4  ;;  %s2806_s15 = scalar_lea.sflag [#allocation3], %s269_s12  ;;  %s2804_s13 = int_to_ptr.vmem [resolvable:$true] %s281_s13 }
  0x43   : > { %s2540_s18 = scalar_lea.hbm %s2798_s10, 4096  ;;  %p2542_p1 = pneg %p2800_p11 }
  0x44   : > { %p2541_p7 = scmp.ne.s32.totalorder %s2798_s10, %s2540_s18  ;;  %s2545_s16 = scalar_lea.hbm %s3060_s0, 8192 }
  0x45   : > { %p2546_p2 = scmp.lt.s32.totalorder %s2798_s10, %s3060_s0  ;;  %p2547_p4 = scmp.lt.s32.totalorder %s2545_s16, %s2540_s18 }
  0x46   : > { %p2543_p9 = pnand %p2542_p1, %p2541_p7 }
  0x47   : > { %p2548_p6 = por %p2547_p4, %p2546_p2 }
  0x48   : > { %p2544_p13 = pneg %p2543_p9 }
  0x4a   : > { %p2549_p12 = pnand %p2548_p6, %p2544_p13 }
  0x4c   : > { %2552 = shalt.err (!%p2549_p12)
}
  0x4d   : > { %s2553_s12 = scalar_lea.vmem %s2804_s13, 4096  ;;  %s2649_s11 = smov [#allocation2]  }
  0x4e   : > { %p2554_p0 = scmp.ne.s32.totalorder %s2804_s13, %s2553_s12  ;;  %s2558_s1 = sshll.u32 %s2649_s11, 4  ;;  %s2559_s1 = int_to_ptr.vmem [resolvable:$false] %s2558_s1 }
  0x4f   : > { %s2560_s19 = scalar_lea.vmem %s2559_s1, 8192  ;;  %p2561_p7 = scmp.lt.s32.totalorder %s2804_s13, %s2559_s1 }
  0x50   : > { %p2556_p5 = pnand %p2554_p0, %p2542_p1  ;;  %p2562_p9 = scmp.lt.s32.totalorder %s2560_s19, %s2553_s12 }
  0x52   : > { %p2557_p3 = pneg %p2556_p5  ;;  %p2563_p10 = por %p2562_p9, %p2561_p7 }
  0x54   : > { %p2564_p8 = pnand %p2563_p10, %p2557_p3 }
  0x56   : > { %2567 = shalt.err (!%p2564_p8)
}
  0x57   : > { %s2650_s18 = smov 256   ;;  %s2651_s22 = smov 16  }
  0x58   : > { %2198 = dma.hbm_to_vmem [thread:$0]  (!%p2800_p11), %s2798_s10, 4096, %s2804_s13, %s2806_s15, %s2650_s18, %s2650_s18, %s2651_s22  }
  0x59   : > { %p3081_p1 = scmp.ne.s32.totalorder %s3075_s9, 0 }
  0x5a   : > { %s2830_s16 = sand.u32 (!%p3081_p1), 1, %s2632_s25   ;;  %p3082_p8 = scmp.ne.s32.totalorder (!%p3081_p1), %s3073_s30, 0 }
  0x5b   : > { %293 = sbr.rel (%p3081_p1) target bundleno = 855 (0x357), region = 48  ;;  %s1947_s1 = sshll.u32 (!%p3081_p1), %s2830_s16, 8 }
  0x5c   : > { %s296_s23 = scalar_lea.sflag (!%p3081_p1), [#allocation3], %s2830_s16  ;;  %s2834_s29 = scalar_lea.vmem (!%p3081_p1), [#allocation2], %s1947_s1 }
  0x60   : > { %2611 = dma.done.wait (%p3082_p8), %s296_s23, 4096  }
  0x61   : > { %2613 = vsyncadd (%p3082_p8), %s296_s23, 4294963200  ;;  %p3083_p10 = scmp.eq.s32.totalorder %s2716_s28, 0 }
  0x63   : > { %2615 = dma.done.wait (%p3083_p10), [#allocation6], 12288   ;;  %p3084_p11 = pmov %p3083_p10 }
  0x64   : > { %p3085_p13 = pmov %p3083_p10 }
  0x65   : > { %2617 = vsyncadd (%p3084_p11), [#allocation6], 4294955008 }
  0x66   : > { %2619 = dma.done.wait (%p3085_p13), [#allocation9], 2048   ;;  %p3086_p2 = pmov %p3083_p10 }
  0x67   : > { %v2254_v0 = vld [vmem:[#allocation5 + $0x74] ss:$8 sps:$4 sm:$0xff]   ;;  %v2258_v2 = vld [vmem:[#allocation5 + $0x70] ss:$8 sps:$4 sm:$0xff]   ;;  %v2260_v4 = vld [vmem:[#allocation5 + $0x64] ss:$8 sps:$4 sm:$0xff]  }
  0x68   : > { %2621 = vsyncadd (%p3086_p2), [#allocation9], 4294965248  ;;  %v2256_v1 = vld [vmem:[#allocation5 + $0x174] ss:$8 sps:$4 sm:$0xff]   ;;  %933 = vmatprep.subr.bf16.mxu0 %v2254_v0  ;;  %v2259_v3 = vld [vmem:[#allocation5 + $0x170] ss:$8 sps:$4 sm:$0xff]  }
  0x69   : > { %1046 = vmatprep.subr.bf16.mxu1 %v2256_v1  ;;  %934 = vmatpush1.bf16.msra.mxu0 %v2258_v2  ;;  %v2262_v5 = vld [vmem:[#allocation5 + $0x164] ss:$8 sps:$4 sm:$0xff]   ;;  %v2264_v6 = vld [vmem:[#allocation5 + $0x60] ss:$8 sps:$4 sm:$0xff]   ;;  %v2266_v8 = vld [vmem:[#allocation5 + $0x54] ss:$8 sps:$4 sm:$0xff]  }
  0x6a   : > { %1047 = vmatpush1.bf16.msra.mxu1 %v2259_v3  ;;  %935 = vmatprep.subr.bf16.mxu0 %v2260_v4  ;;  %v2265_v7 = vld [vmem:[#allocation5 + $0x160] ss:$8 sps:$4 sm:$0xff]   ;;  %v2268_v9 = vld [vmem:[#allocation5 + $0x154] ss:$8 sps:$4 sm:$0xff]   ;;  %v2270_v10 = vld [vmem:[#allocation5 + $0x50] ss:$8 sps:$4 sm:$0xff]  }
  0x6b   : > { %1048 = vmatprep.subr.bf16.mxu1 %v2262_v5  ;;  %v2271_v11 = vld [vmem:[#allocation5 + $0x150] ss:$8 sps:$4 sm:$0xff]   ;;  %v2272_v12 = vld [vmem:[#allocation5 + $0x44] ss:$8 sps:$4 sm:$0xff]   ;;  %v2276_v14 = vld [vmem:[#allocation5 + $0x40] ss:$8 sps:$4 sm:$0xff]  }
  0x6c   : > { %v2274_v13 = vld [vmem:[#allocation5 + $0x144] ss:$8 sps:$4 sm:$0xff]   ;;  %v2277_v15 = vld [vmem:[#allocation5 + $0x140] ss:$8 sps:$4 sm:$0xff]   ;;  %v2278_v16 = vld [vmem:[#allocation5 + $0x34] ss:$8 sps:$4 sm:$0xff]  }
  0x6d   : > { %936 = vmatpush1.bf16.msra.mxu0 %v2264_v6  ;;  %v2280_v17 = vld [vmem:[#allocation5 + $0x134] ss:$8 sps:$4 sm:$0xff]   ;;  %v2282_v18 = vld [vmem:[#allocation5 + $0x30] ss:$8 sps:$4 sm:$0xff]   ;;  %v2284_v20 = vld [vmem:[#allocation5 + $0x24] ss:$8 sps:$4 sm:$0xff]  }
  0x6e   : > { %1049 = vmatpush1.bf16.msra.mxu1 %v2265_v7  ;;  %937 = vmatprep.subr.bf16.mxu0 %v2266_v8  ;;  %v2283_v19 = vld [vmem:[#allocation5 + $0x130] ss:$8 sps:$4 sm:$0xff]   ;;  %v2286_v21 = vld [vmem:[#allocation5 + $0x124] ss:$8 sps:$4 sm:$0xff]   ;;  %v2288_v22 = vld [vmem:[#allocation5 + $0x20] ss:$8 sps:$4 sm:$0xff]  }
  0x6f   : > { %1050 = vmatprep.subr.bf16.mxu1 %v2268_v9  ;;  %v2289_v23 = vld [vmem:[#allocation5 + $0x120] ss:$8 sps:$4 sm:$0xff]   ;;  %v2290_v24 = vld [vmem:[#allocation5 + $0x14] ss:$8 sps:$4 sm:$0xff]   ;;  %v2294_v26 = vld [vmem:[#allocation5 + $0x10] ss:$8 sps:$4 sm:$0xff]  }
  0x70   : > { %v2292_v25 = vld [vmem:[#allocation5 + $0x114] ss:$8 sps:$4 sm:$0xff]   ;;  %v2295_v27 = vld [vmem:[#allocation5 + $0x110] ss:$8 sps:$4 sm:$0xff]   ;;  %v2296_v28 = vld [vmem:[#allocation5 + $0x4] ss:$8 sps:$4 sm:$0xff]  }
  0x71   : > { %938 = vmatpush1.bf16.msra.mxu0 %v2270_v10  ;;  %v2298_v29 = vld [vmem:[#allocation5 + $0x104] ss:$8 sps:$4 sm:$0xff]   ;;  %v2300_v30 = vld [vmem:[#allocation5] ss:$8 sps:$4 sm:$0xff]   ;;  %v2302_v32 = vld [vmem:[#allocation5 + $0xf4] ss:$8 sps:$4 sm:$0xff]  }
  0x72   : > { %1051 = vmatpush1.bf16.msra.mxu1 %v2271_v11  ;;  %939 = vmatprep.subr.bf16.mxu0 %v2272_v12  ;;  %v2301_v31 = vld [vmem:[#allocation5 + $0x100] ss:$8 sps:$4 sm:$0xff]   ;;  %v2304_v33 = vld [vmem:[#allocation5 + $0x1f4] ss:$8 sps:$4 sm:$0xff]   ;;  %v2306_v34 = vld [vmem:[#allocation5 + $0xf0] ss:$8 sps:$4 sm:$0xff]  }
  0x73   : > { %1052 = vmatprep.subr.bf16.mxu1 %v2274_v13  ;;  %v2307_v35 = vld [vmem:[#allocation5 + $0x1f0] ss:$8 sps:$4 sm:$0xff]   ;;  %v2308_v36 = vld [vmem:[#allocation5 + $0xe4] ss:$8 sps:$4 sm:$0xff]   ;;  %v2312_v38 = vld [vmem:[#allocation5 + $0xe0] ss:$8 sps:$4 sm:$0xff]  }
  0x74   : > { %v2310_v37 = vld [vmem:[#allocation5 + $0x1e4] ss:$8 sps:$4 sm:$0xff]   ;;  %v2313_v39 = vld [vmem:[#allocation5 + $0x1e0] ss:$8 sps:$4 sm:$0xff]   ;;  %v2314_v40 = vld [vmem:[#allocation5 + $0xd4] ss:$8 sps:$4 sm:$0xff]  }
  0x75   : > { %940 = vmatpush1.bf16.msra.mxu0 %v2276_v14  ;;  %v2316_v41 = vld [vmem:[#allocation5 + $0x1d4] ss:$8 sps:$4 sm:$0xff]   ;;  %v2318_v42 = vld [vmem:[#allocation5 + $0xd0] ss:$8 sps:$4 sm:$0xff]   ;;  %v2320_v44 = vld [vmem:[#allocation5 + $0xc4] ss:$8 sps:$4 sm:$0xff]  }
  0x76   : > { %1053 = vmatpush1.bf16.msra.mxu1 %v2277_v15  ;;  %941 = vmatprep.subr.bf16.mxu0 %v2278_v16  ;;  %v2319_v43 = vld [vmem:[#allocation5 + $0x1d0] ss:$8 sps:$4 sm:$0xff]   ;;  %v2322_v45 = vld [vmem:[#allocation5 + $0x1c4] ss:$8 sps:$4 sm:$0xff]   ;;  %v2324_v46 = vld [vmem:[#allocation5 + $0xc0] ss:$8 sps:$4 sm:$0xff]  }
  0x77   : > { %1054 = vmatprep.subr.bf16.mxu1 %v2280_v17  ;;  %v2325_v47 = vld [vmem:[#allocation5 + $0x1c0] ss:$8 sps:$4 sm:$0xff]   ;;  %v2326_v48 = vld [vmem:[#allocation5 + $0xb4] ss:$8 sps:$4 sm:$0xff]   ;;  %v2330_v52 = vld [vmem:[#allocation5 + $0xb0] ss:$8 sps:$4 sm:$0xff]  }
  0x78   : > { %v2352_v49 = vld [vmem:[%s2834_s29 + $0x4] ss:$16 sps:$4 sm:$0xff]   ;;  %v2355_v51 = vld [vmem:[%s2834_s29 + $0xc] ss:$16 sps:$4 sm:$0xff]   ;;  %v2331_v53 = vld [vmem:[#allocation5 + $0x1b0] ss:$8 sps:$4 sm:$0xff]  }
  0x79   : > { %942 = vmatpush1.bf16.msra.mxu0 %v2282_v18  ;;  %v2328_v50 = vld [vmem:[#allocation5 + $0x1b4] ss:$8 sps:$4 sm:$0xff]   ;;  %965 = vmatprep.mubr.bf16.mxu0 %v2352_v49  ;;  %v2332_v54 = vld [vmem:[#allocation5 + $0xa4] ss:$8 sps:$4 sm:$0xff]   ;;  %v2336_v56 = vld [vmem:[#allocation5 + $0xa0] ss:$8 sps:$4 sm:$0xff]  }
  0x7a   : > { %1055 = vmatpush1.bf16.msra.mxu1 %v2283_v19  ;;  %943 = vmatprep.subr.bf16.mxu0 %v2284_v20  ;;  %v2334_v55 = vld [vmem:[#allocation5 + $0x1a4] ss:$8 sps:$4 sm:$0xff]   ;;  %v2337_v57 = vld [vmem:[#allocation5 + $0x1a0] ss:$8 sps:$4 sm:$0xff]   ;;  %v2338_v58 = vld [vmem:[#allocation5 + $0x94] ss:$8 sps:$4 sm:$0xff]  }
  0x7b   : > { %1056 = vmatprep.subr.bf16.mxu1 %v2286_v21  ;;  %1078 = vmatprep.mubr.bf16.mxu1 %v2355_v51  ;;  %v2340_v59 = vld [vmem:[#allocation5 + $0x194] ss:$8 sps:$4 sm:$0xff]   ;;  %v2342_v60 = vld [vmem:[#allocation5 + $0x90] ss:$8 sps:$4 sm:$0xff]   ;;  %v2344_v62 = vld [vmem:[#allocation5 + $0x84] ss:$8 sps:$4 sm:$0xff]  }
  0x7c   : > { %v2343_v61 = vld [vmem:[#allocation5 + $0x190] ss:$8 sps:$4 sm:$0xff]   ;;  %v2346_v63 = vld [vmem:[#allocation5 + $0x184] ss:$8 sps:$4 sm:$0xff]   ;;  %v2348_v0 = vld [vmem:[#allocation5 + $0x80] ss:$8 sps:$4 sm:$0xff]  }
  0x7d   : > { %944 = vmatpush1.bf16.msra.mxu0 %v2288_v22  ;;  %v2349_v1 = vld [vmem:[#allocation5 + $0x180] ss:$8 sps:$4 sm:$0xff]   ;;  %v2356_v4 = vld [vmem:[%s2834_s29 + $0x24] ss:$16 sps:$4 sm:$0xff]   ;;  %v2358_v5 = vld [vmem:[%s2834_s29 + $0x2c] ss:$16 sps:$4 sm:$0xff]  }
  0x7e   : > { %1057 = vmatpush1.bf16.msra.mxu1 %v2289_v23  ;;  %945 = vmatprep.subr.bf16.mxu0 %v2290_v24  ;;  %v2350_v2 = vld [vmem:[%s2834_s29] ss:$16 sps:$4 sm:$0xff]   ;;  %v2353_v3 = vld [vmem:[%s2834_s29 + $0x8] ss:$16 sps:$4 sm:$0xff]   ;;  %v2400_v6 = vld [vmem:[#allocation7 + $0x74] ss:$8 sps:$4 sm:$0xff]  }
  0x7f   : > { %1058 = vmatprep.subr.bf16.mxu1 %v2292_v25  ;;  %v2398_v7 = vld [vmem:[#allocation7 + $0x70] ss:$8 sps:$4 sm:$0xff]   ;;  %v2403_v8 = vld [vmem:[#allocation7 + $0x64] ss:$8 sps:$4 sm:$0xff]   ;;  %v2401_v10 = vld [vmem:[#allocation7 + $0x60] ss:$8 sps:$4 sm:$0xff]  }
  0x80   : > { %v2360_v9 = vld [vmem:[%s2834_s29 + $0x20] ss:$16 sps:$4 sm:$0xff]   ;;  %v2361_v11 = vld [vmem:[%s2834_s29 + $0x28] ss:$16 sps:$4 sm:$0xff]   ;;  %v2362_v12 = vld [vmem:[%s2834_s29 + $0x44] ss:$16 sps:$4 sm:$0xff]  }
  0x81   : > { %946 = vmatpush1.bf16.msra.mxu0 %v2294_v26  ;;  %v2364_v13 = vld [vmem:[%s2834_s29 + $0x4c] ss:$16 sps:$4 sm:$0xff]   ;;  %v2404_v15 = vld [vmem:[#allocation7 + $0x50] ss:$8 sps:$4 sm:$0xff]   ;;  %v2407_v19 = vld [vmem:[#allocation7 + $0x40] ss:$8 sps:$4 sm:$0xff]  }
  0x82   : > { %1059 = vmatpush1.bf16.msra.mxu1 %v2295_v27  ;;  %947 = vmatprep.subr.bf16.mxu0 %v2296_v28  ;;  %v2406_v14 = vld [vmem:[#allocation7 + $0x54] ss:$8 sps:$4 sm:$0xff]   ;;  %v2409_v16 = vld [vmem:[#allocation7 + $0x44] ss:$8 sps:$4 sm:$0xff]   ;;  %v2366_v17 = vld [vmem:[%s2834_s29 + $0x40] ss:$16 sps:$4 sm:$0xff]  }
  0x83   : > { %1060 = vmatprep.subr.bf16.mxu1 %v2298_v29  ;;  %v2367_v18 = vld [vmem:[%s2834_s29 + $0x48] ss:$16 sps:$4 sm:$0xff]   ;;  %v2368_v20 = vld [vmem:[%s2834_s29 + $0x64] ss:$16 sps:$4 sm:$0xff]   ;;  %v2370_v21 = vld [vmem:[%s2834_s29 + $0x6c] ss:$16 sps:$4 sm:$0xff]  }
  0x84   : > { %v2410_v22 = vld [vmem:[#allocation7 + $0x30] ss:$8 sps:$4 sm:$0xff]   ;;  %v2412_v23 = vld [vmem:[#allocation7 + $0x34] ss:$8 sps:$4 sm:$0xff]   ;;  %v2415_v24 = vld [vmem:[#allocation7 + $0x24] ss:$8 sps:$4 sm:$0xff]  }
  0x85   : > { %948 = vmatpush1.bf16.msra.mxu0 %v2300_v30  ;;  %v2413_v25 = vld [vmem:[#allocation7 + $0x20] ss:$8 sps:$4 sm:$0xff]   ;;  %v2374_v28 = vld [vmem:[%s2834_s29 + $0x84] ss:$16 sps:$4 sm:$0xff]   ;;  %v2376_v29 = vld [vmem:[%s2834_s29 + $0x8c] ss:$16 sps:$4 sm:$0xff]  }
  0x86   : > { %1061 = vmatpush1.bf16.msra.mxu1 %v2301_v31  ;;  %949 = vmatprep.subr.bf16.mxu0 %v2302_v32  ;;  %v2372_v26 = vld [vmem:[%s2834_s29 + $0x60] ss:$16 sps:$4 sm:$0xff]   ;;  %v2373_v27 = vld [vmem:[%s2834_s29 + $0x68] ss:$16 sps:$4 sm:$0xff]   ;;  %v2418_v30 = vld [vmem:[#allocation7 + $0x14] ss:$8 sps:$4 sm:$0xff]  }
  0x87   : > { %1062 = vmatprep.subr.bf16.mxu1 %v2304_v33  ;;  %v2416_v31 = vld [vmem:[#allocation7 + $0x10] ss:$8 sps:$4 sm:$0xff]   ;;  %v2421_v32 = vld [vmem:[#allocation7 + $0x4] ss:$8 sps:$4 sm:$0xff]   ;;  %v2419_v33 = vld [vmem:[#allocation7] ss:$8 sps:$4 sm:$0xff]  }
  0x88   : > { %v2431_v49 = vld [vmem:[#allocation7 + $0xc0] ss:$8 sps:$4 sm:$0xff]   ;;  %s1951_s14 = sshll.u32 %s2830_s16, 7  ;;  %s2104_s19 = sshll.u32 %s2716_s28, 11 }
  0x89   : > { %950 = vmatpush2.bf16.msra.mxu0 %v2306_v34  ;;  %v2378_v34 = vld [vmem:[%s2834_s29 + $0x80] ss:$16 sps:$4 sm:$0xff]   ;;  %v2391_v51 = vld [vmem:[%s2834_s29 + $0xc8] ss:$16 sps:$4 sm:$0xff]   ;;  %s2977_s11 = scalar_lea.vmem [#allocation10], %s1951_s14  ;;  %s3013_s23 = scalar_lea.hbm %s3067_s7, %s2104_s19 }
  0x8a   : > { %1063 = vmatpush2.bf16.msra.mxu1 %v2307_v35  ;;  %951 = vmatprep.subr.bf16.mxu0 %v2308_v36  ;;  %v2379_v35 = vld [vmem:[%s2834_s29 + $0x88] ss:$16 sps:$4 sm:$0xff]   ;;  %v2380_v36 = vld [vmem:[%s2834_s29 + $0xa4] ss:$16 sps:$4 sm:$0xff]   ;;  %s1834_s18 = sshll.u32 %s2977_s11, 4  ;;  %p3087_p6 = scmp.ne.s32.totalorder %s3079_s21, 0  ;;  %s3015_s18 = int_to_ptr.vmem [resolvable:$true] %s1834_s18 }
  0x8b   : > { %1064 = vmatprep.subr.bf16.mxu1 %v2310_v37  ;;  %v2382_v37 = vld [vmem:[%s2834_s29 + $0xac] ss:$16 sps:$4 sm:$0xff]   ;;  %s2568_s30 = scalar_lea.vmem %s3015_s18, 2048  ;;  %s2652_s28 = smov [#allocation10]  }
  0x8c   : > { %p2569_p4 = scmp.ne.s32.totalorder %s3015_s18, %s2568_s30  ;;  %s2572_s9 = sshll.u32 %s2652_s28, 4  ;;  %s2573_s9 = int_to_ptr.vmem [resolvable:$false] %s2572_s9 }
  0x8d   : > { %952 = vmatpush2.bf16.msra.mxu0 %v2312_v38  ;;  %v2424_v38 = vld [vmem:[#allocation7 + $0xf4] ss:$8 sps:$4 sm:$0xff]   ;;  %s2574_s10 = scalar_lea.vmem %s2573_s9, 4096  ;;  %p2575_p5 = scmp.lt.s32.totalorder %s3015_s18, %s2573_s9 }
  0x8e   : > { %1065 = vmatpush2.bf16.msra.mxu1 %v2313_v39  ;;  %953 = vmatprep.subr.bf16.mxu0 %v2314_v40  ;;  %v2422_v39 = vld [vmem:[#allocation7 + $0xf0] ss:$8 sps:$4 sm:$0xff]   ;;  %v2427_v40 = vld [vmem:[#allocation7 + $0xe4] ss:$8 sps:$4 sm:$0xff]   ;;  %p2570_p12 = pnand %p2569_p4, %p3087_p6  ;;  %p2576_p3 = scmp.lt.s32.totalorder %s2574_s10, %s2568_s30 }
  0x8f   : > { %1066 = vmatprep.subr.bf16.mxu1 %v2316_v41  ;;  %v2425_v41 = vld [vmem:[#allocation7 + $0xe0] ss:$8 sps:$4 sm:$0xff]  }
  0x90   : > { %p2571_p0 = pneg %p2570_p12  ;;  %p2577_p7 = por %p2576_p3, %p2575_p5 }
  0x91   : > { %954 = vmatpush2.bf16.msra.mxu0 %v2318_v42  ;;  %v2384_v42 = vld [vmem:[%s2834_s29 + $0xa0] ss:$16 sps:$4 sm:$0xff]  }
  0x92   : > { %1067 = vmatpush2.bf16.msra.mxu1 %v2319_v43  ;;  %955 = vmatprep.subr.bf16.mxu0 %v2320_v44  ;;  %v2385_v43 = vld [vmem:[%s2834_s29 + $0xa8] ss:$16 sps:$4 sm:$0xff]   ;;  %v2386_v44 = vld [vmem:[%s2834_s29 + $0xc4] ss:$16 sps:$4 sm:$0xff]   ;;  %p2578_p9 = pnand %p2577_p7, %p2571_p0 }
  0x93   : > { %1068 = vmatprep.subr.bf16.mxu1 %v2322_v45  ;;  %v2388_v45 = vld [vmem:[%s2834_s29 + $0xcc] ss:$16 sps:$4 sm:$0xff]  }
  0x95   : > { %956 = vmatpush2.bf16.msra.mxu0 %v2324_v46  ;;  %v2430_v46 = vld [vmem:[#allocation7 + $0xd4] ss:$8 sps:$4 sm:$0xff]  }
  0x96   : > { %1069 = vmatpush2.bf16.msra.mxu1 %v2325_v47  ;;  %957 = vmatprep.subr.bf16.mxu0 %v2326_v48  ;;  %v2428_v47 = vld [vmem:[#allocation7 + $0xd0] ss:$8 sps:$4 sm:$0xff]   ;;  %v2433_v48 = vld [vmem:[#allocation7 + $0xc4] ss:$8 sps:$4 sm:$0xff]  }
  0x97   : > { %1070 = vmatprep.subr.bf16.mxu1 %v2328_v50  ;;  %v2390_v50 = vld [vmem:[%s2834_s29 + $0xc0] ss:$16 sps:$4 sm:$0xff]  }
  0x99   : > { %958 = vmatpush2.bf16.msra.mxu0 %v2330_v52  ;;  %v2392_v52 = vld [vmem:[%s2834_s29 + $0xe4] ss:$16 sps:$4 sm:$0xff]  }
  0x9a   : > { %1071 = vmatpush2.bf16.msra.mxu1 %v2331_v53  ;;  %959 = vmatprep.subr.bf16.mxu0 %v2332_v54  ;;  %v2394_v53 = vld [vmem:[%s2834_s29 + $0xec] ss:$16 sps:$4 sm:$0xff]  }
  0x9b   : > { %1072 = vmatprep.subr.bf16.mxu1 %v2334_v55  ;;  %v2436_v54 = vld [vmem:[#allocation7 + $0xb4] ss:$8 sps:$4 sm:$0xff]   ;;  %v2434_v55 = vld [vmem:[#allocation7 + $0xb0] ss:$8 sps:$4 sm:$0xff]  }
  0x9d   : > { %960 = vmatpush2.bf16.msra.mxu0 %v2336_v56  ;;  %v2396_v56 = vld [vmem:[%s2834_s29 + $0xe0] ss:$16 sps:$4 sm:$0xff]  }
  0x9e   : > { %1073 = vmatpush2.bf16.msra.mxu1 %v2337_v57  ;;  %961 = vmatprep.subr.bf16.mxu0 %v2338_v58  ;;  %v2397_v57 = vld [vmem:[%s2834_s29 + $0xe8] ss:$16 sps:$4 sm:$0xff]   ;;  %v2439_v58 = vld [vmem:[#allocation7 + $0xa4] ss:$8 sps:$4 sm:$0xff]   ;;  %s1821_s29 = scalar_lea.sflag [#allocation4], %s2830_s16 }
  0x9f   : > { %1074 = vmatprep.subr.bf16.mxu1 %v2340_v59  ;;  %v2437_v59 = vld [vmem:[#allocation7 + $0xa0] ss:$8 sps:$4 sm:$0xff]  }
  0xa1   : > { %962 = vmatpush2.bf16.msra.mxu0 %v2342_v60  ;;  %v2442_v60 = vld [vmem:[#allocation7 + $0x94] ss:$8 sps:$4 sm:$0xff]  }
  0xa2   : > { %1075 = vmatpush2.bf16.msra.mxu1 %v2343_v61  ;;  %963 = vmatprep.subr.bf16.mxu0 %v2344_v62  ;;  %v2440_v61 = vld [vmem:[#allocation7 + $0x90] ss:$8 sps:$4 sm:$0xff]   ;;  %v2445_v62 = vld [vmem:[#allocation7 + $0x84] ss:$8 sps:$4 sm:$0xff]  }
  0xa3   : > { %1076 = vmatprep.subr.bf16.mxu1 %v2346_v63  ;;  %v2443_v63 = vld [vmem:[#allocation7 + $0x80] ss:$8 sps:$4 sm:$0xff]  }
  0xa5   : > { %964 = vmatpush2.bf16.msra.mxu0 %v2348_v0  ;;  %v2446_v0 = vld [vmem:[#allocation8 + $0x78] sm:$0xff]  }
  0xa6   : > { %1077 = vmatpush2.bf16.msra.mxu1 %v2349_v1  ;;  %1411 = vmatprep.subr.bf16.mxu0 %v2400_v6  ;;  %v2447_v1 = vld [vmem:[#allocation8 + $0x38] sm:$0xff]   ;;  %v2452_v6 = vld [vmem:[#allocation8 + $0x60] sm:$0xff]  }
  0xa7   : > { %2105 = vmatprep.subr.bf16.mxu1 %v2446_v0 }
  0xa8   : > { %966 = vmatmul.mubr.bf16.vlgmr.msra.gmra.mxu0 %v2350_v2  ;;  %v2448_v2 = vld [vmem:[#allocation8 + $0x70] sm:$0xff]  }
  0xa9   : > { %1079 = vmatmul.mubr.bf16.vlgmr.msra.gmra.mxu1 %v2353_v3  ;;  %975 = vmatprep.mubr.bf16.mxu0 %v2356_v4  ;;  %v2449_v3 = vld [vmem:[#allocation8 + $0x30] sm:$0xff]   ;;  %v2450_v4 = vld [vmem:[#allocation8 + $0x68] sm:$0xff]  }
  0xaa   : > { %1088 = vmatprep.mubr.bf16.mxu1 %v2358_v5  ;;  %1412 = vmatpush1.bf16.msra.mxu0 %v2398_v7  ;;  %v2451_v5 = vld [vmem:[#allocation8 + $0x28] sm:$0xff]   ;;  %v2453_v7 = vld [vmem:[#allocation8 + $0x20] sm:$0xff]  }
  0xab   : > { %1413 = vmatprep.subr.bf16.mxu0 %v2403_v8  ;;  %2106 = vmatpush3.bf16.msra.mxu1 %v2447_v1  ;;  %v2454_v8 = vld [vmem:[#allocation8 + $0x58] sm:$0xff]  }
  0xac   : > { %2107 = vmatprep.subr.bf16.mxu1 %v2448_v2 }
  0xae   : > { %1414 = vmatpush1.bf16.msra.mxu0 %v2401_v10  ;;  %v2456_v10 = vld [vmem:[#allocation8 + $0x50] sm:$0xff]  }
  0xaf   : > { %1415 = vmatprep.subr.bf16.mxu0 %v2406_v14  ;;  %2108 = vmatpush3.bf16.msra.mxu1 %v2449_v3  ;;  %v443_v14 = vlaneseq }
  0xb0   : > { %976 = vmatmul.mubr.bf16.gmra.mxu0 %v2360_v9  ;;  %2109 = vmatprep.subr.bf16.mxu1 %v2450_v4  ;;  %v2455_v9 = vld [vmem:[#allocation8 + $0x18] sm:$0xff]  }
  0xb1   : > { %1089 = vmatmul.mubr.bf16.gmra.mxu1 %v2361_v11  ;;  %985 = vmatprep.mubr.bf16.mxu0 %v2362_v12  ;;  %v2457_v11 = vld [vmem:[#allocation8 + $0x10] sm:$0xff]   ;;  %v2458_v12 = vld [vmem:[#allocation8 + $0x48] sm:$0xff]  }
  0xb2   : > { %1098 = vmatprep.mubr.bf16.mxu1 %v2364_v13  ;;  %1416 = vmatpush1.bf16.msra.mxu0 %v2404_v15  ;;  %v2459_v13 = vld [vmem:[#allocation8 + $0x8] sm:$0xff]   ;;  %v2880_v15 = vshrl.u32 %v443_v14, 7 }
  0xb3   : > { %1417 = vmatprep.subr.bf16.mxu0 %v2409_v16  ;;  %2110 = vmatpush3.bf16.msra.mxu1 %v2451_v5 }
  0xb4   : > { %2111 = vmatprep.subr.bf16.mxu1 %v2452_v6  ;;  %v449_v16 = vsub.s32 1, %v2880_v15 }
  0xb6   : > { %1418 = vmatpush1.bf16.msra.mxu0 %v2407_v19 }
  0xb7   : > { %1419 = vmatprep.subr.bf16.mxu0 %v2412_v23  ;;  %2112 = vmatpush3.bf16.msra.mxu1 %v2453_v7 }
  0xb8   : > { %986 = vmatmul.mubr.bf16.gmra.mxu0 %v2366_v17  ;;  %2113 = vmatprep.subr.bf16.mxu1 %v2454_v8  ;;  %v445_v17 = vsub.s32 0, %v2880_v15 }
  0xb9   : > { %1099 = vmatmul.mubr.bf16.gmra.mxu1 %v2367_v18  ;;  %995 = vmatprep.mubr.bf16.mxu0 %v2368_v20  ;;  %v441_v18 = vld [vmem:[%s3062_s2] sm:$0x3] }
  0xba   : > { %1108 = vmatprep.mubr.bf16.mxu1 %v2370_v21  ;;  %1420 = vmatpush1.bf16.msra.mxu0 %v2410_v22  ;;  %v2889_v19 = vrot.slane %v441_v18, %v449_v16  ;;  %v2893_v20 = vrot.slane %v441_v18, %v445_v17 }
  0xbb   : > { %1421 = vmatprep.subr.bf16.mxu0 %v2415_v24  ;;  %2114 = vmatpush3.bf16.msra.mxu1 %v2455_v9 }
  0xbc   : > { %2115 = vmatprep.subr.bf16.mxu1 %v2456_v10 }
  0xbe   : > { %1422 = vmatpush1.bf16.msra.mxu0 %v2413_v25 }
  0xbf   : > { %1423 = vmatprep.subr.bf16.mxu0 %v2418_v30  ;;  %2116 = vmatpush3.bf16.msra.mxu1 %v2457_v11 }
  0xc0   : > { %996 = vmatmul.mubr.bf16.gmra.mxu0 %v2372_v26  ;;  %2117 = vmatprep.subr.bf16.mxu1 %v2458_v12 }
  0xc1   : > { %1109 = vmatmul.mubr.bf16.gmra.mxu1 %v2373_v27  ;;  %1005 = vmatprep.mubr.bf16.mxu0 %v2374_v28 }
  0xc2   : > { %1118 = vmatprep.mubr.bf16.mxu1 %v2376_v29  ;;  %1424 = vmatpush1.bf16.msra.mxu0 %v2416_v31 }
  0xc3   : > { %1425 = vmatprep.subr.bf16.mxu0 %v2421_v32  ;;  %2118 = vmatpush3.bf16.msra.mxu1 %v2459_v13 }
  0xc6   : > { %1426 = vmatpush1.bf16.msra.mxu0 %v2419_v33 }
  0xc7   : > { %1427 = vmatprep.subr.bf16.mxu0 %v2424_v38 }
  0xc8   : > { %1006 = vmatmul.mubr.bf16.gmra.mxu0 %v2378_v34 }
  0xc9   : > { %1119 = vmatmul.mubr.bf16.gmra.mxu1 %v2379_v35  ;;  %1015 = vmatprep.mubr.bf16.mxu0 %v2380_v36 }
  0xca   : > { %1128 = vmatprep.mubr.bf16.mxu1 %v2382_v37  ;;  %1428 = vmatpush2.bf16.msra.mxu0 %v2422_v39 }
  0xcb   : > { %1429 = vmatprep.subr.bf16.mxu0 %v2427_v40 }
  0xce   : > { %1430 = vmatpush2.bf16.msra.mxu0 %v2425_v41 }
  0xcf   : > { %1431 = vmatprep.subr.bf16.mxu0 %v2430_v46 }
  0xd0   : > { %1016 = vmatmul.mubr.bf16.gmra.mxu0 %v2384_v42 }
  0xd1   : > { %1129 = vmatmul.mubr.bf16.gmra.mxu1 %v2385_v43  ;;  %1025 = vmatprep.mubr.bf16.mxu0 %v2386_v44 }
  0xd2   : > { %1138 = vmatprep.mubr.bf16.mxu1 %v2388_v45  ;;  %1432 = vmatpush2.bf16.msra.mxu0 %v2428_v47 }
  0xd3   : > { %1433 = vmatprep.subr.bf16.mxu0 %v2433_v48 }
  0xd6   : > { %1434 = vmatpush2.bf16.msra.mxu0 %v2431_v49 }
  0xd7   : > { %1435 = vmatprep.subr.bf16.mxu0 %v2436_v54 }
  0xd8   : > { %1026 = vmatmul.mubr.bf16.gmra.mxu0 %v2390_v50 }
  0xd9   : > { %1139 = vmatmul.mubr.bf16.gmra.mxu1 %v2391_v51  ;;  %1035 = vmatprep.mubr.bf16.mxu0 %v2392_v52 }
  0xda   : > { %1148 = vmatprep.mubr.bf16.mxu1 %v2394_v53  ;;  %1436 = vmatpush2.bf16.msra.mxu0 %v2434_v55 }
  0xdb   : > { %1437 = vmatprep.subr.bf16.mxu0 %v2439_v58 }
  0xde   : > { %1438 = vmatpush2.bf16.msra.mxu0 %v2437_v59 }
  0xdf   : > { %1439 = vmatprep.subr.bf16.mxu0 %v2442_v60 }
  0xe0   : > { %1036 = vmatmul.mubr.bf16.gmra.mxu0 %v2396_v56 }
  0xe1   : > { %1149 = vmatmul.mubr.bf16.gmra.mxu1 %v2397_v57 }
  0xe2   : > { %1440 = vmatpush2.bf16.msra.mxu0 %v2440_v61 }
  0xe3   : > { %1441 = vmatprep.subr.bf16.mxu0 %v2445_v62 }
  0xe6   : > { %1442 = vmatpush2.bf16.msra.mxu0 %v2443_v63 }
 0x168   : > { %v967_v21 = vpop.f32.mrf.mxu0 }
 0x169   : > { %v1080_v22 = vpop.f32.mrf.mxu1  ;;  %v968_v26 = vadd.f32 %v967_v21, %v2893_v20 }
 0x16a   : > { %v969_v23 = vpop.f32.mrf.mxu0 }
 0x16b   : > { %v1082_v24 = vpop.f32.mrf.mxu1  ;;  %v970_v25 = vadd.f32 %v969_v23, %v2889_v19  ;;  %v1081_v35 = vadd.f32 %v1080_v22, %v968_v26 }
 0x16c   : > { %v971_v27 = vpop.f32.mrf.mxu0 }
 0x16d   : > { %v1084_v28 = vpop.f32.mrf.mxu1  ;;  %v972_v29 = vadd.f32 %v971_v27, %v2893_v20  ;;  %v1083_v32 = vadd.f32 %v1082_v24, %v970_v25  ;;  %v1159_v45 = vmax.f32 %v1081_v35, 0.0 }
 0x16e   : > { %v973_v30 = vpop.f32.mrf.mxu0 }
 0x16f   : > { %v1086_v31 = vpop.f32.mrf.mxu1  ;;  %v1085_v33 = vadd.f32 %v1084_v28, %v972_v29  ;;  %v974_v34 = vadd.f32 %v973_v30, %v2889_v19  ;;  %v1160_v42 = vmax.f32 %v1083_v32, 0.0 }
 0x170   : > { %v977_v36 = vpop.f32.mrf.mxu0 }
 0x171   : > { %v1090_v37 = vpop.f32.mrf.mxu1  ;;  %v1087_v38 = vadd.f32 %v1086_v31, %v974_v34  ;;  %v1161_v39 = vmax.f32 %v1085_v33, 0.0  ;;  %v978_v46 = vadd.f32 %v977_v36, %v2893_v20 }
 0x172   : > { %v979_v40 = vpop.f32.mrf.mxu0 }
 0x173   : > { %v1092_v41 = vpop.f32.mrf.mxu1  ;;  %v1162_v43 = vmax.f32 %v1087_v38, 0.0  ;;  %v980_v44 = vadd.f32 %v979_v40, %v2889_v19  ;;  %v1191_v51 = vpack.c.bf16 %v1161_v39, %v1159_v45  ;;  %v1091_v57 = vadd.f32 %v1090_v37, %v978_v46 }
 0x174   : > { %v981_v47 = vpop.f32.mrf.mxu0 }
 0x175   : > { %v1094_v48 = vpop.f32.mrf.mxu1  ;;  %v1192_v49 = vpack.c.bf16 %v1162_v43, %v1160_v42  ;;  %v982_v50 = vadd.f32 %v981_v47, %v2893_v20  ;;  %v1093_v54 = vadd.f32 %v1092_v41, %v980_v44  ;;  %v1163_v3 = vmax.f32 %v1091_v57, 0.0 }
 0x176   : > { %v983_v52 = vpop.f32.mrf.mxu0 }
 0x177   : > { %v1096_v53 = vpop.f32.mrf.mxu1  ;;  %v1095_v55 = vadd.f32 %v1094_v48, %v982_v50  ;;  %v984_v56 = vadd.f32 %v983_v52, %v2889_v19  ;;  %1443 = vmatprep.mubr.bf16.mxu0 %v1192_v49  ;;  %v1164_v0 = vmax.f32 %v1093_v54, 0.0 }
 0x178   : > { %v987_v58 = vpop.f32.mrf.mxu0  ;;  %1444 = vmatmul.mubr.bf16.vlgmr.msra.gmra.mxu0 %v1191_v51 }
 0x179   : > { %v1100_v59 = vpop.f32.mrf.mxu1  ;;  %v1097_v60 = vadd.f32 %v1096_v53, %v984_v56  ;;  %v1165_v61 = vmax.f32 %v1095_v55, 0.0  ;;  %v988_v4 = vadd.f32 %v987_v58, %v2893_v20 }
 0x17a   : > { %v989_v62 = vpop.f32.mrf.mxu0 }
 0x17b   : > { %v1102_v63 = vpop.f32.mrf.mxu1  ;;  %v1166_v1 = vmax.f32 %v1097_v60, 0.0  ;;  %v990_v2 = vadd.f32 %v989_v62, %v2889_v19  ;;  %v1193_v9 = vpack.c.bf16 %v1165_v61, %v1163_v3  ;;  %v1101_v18 = vadd.f32 %v1100_v59, %v988_v4 }
 0x17c   : > { %v991_v5 = vpop.f32.mrf.mxu0 }
 0x17d   : > { %v1104_v6 = vpop.f32.mrf.mxu1  ;;  %v1194_v7 = vpack.c.bf16 %v1166_v1, %v1164_v0  ;;  %v992_v8 = vadd.f32 %v991_v5, %v2893_v20  ;;  %v1103_v12 = vadd.f32 %v1102_v63, %v990_v2  ;;  %v1167_v30 = vmax.f32 %v1101_v18, 0.0 }
 0x17e   : > { %v993_v10 = vpop.f32.mrf.mxu0 }
 0x17f   : > { %v1106_v11 = vpop.f32.mrf.mxu1  ;;  %v1105_v13 = vadd.f32 %v1104_v6, %v992_v8  ;;  %v994_v14 = vadd.f32 %v993_v10, %v2889_v19  ;;  %1453 = vmatprep.mubr.bf16.mxu0 %v1194_v7  ;;  %v1168_v27 = vmax.f32 %v1103_v12, 0.0 }
 0x180   : > { %v997_v21 = vpop.f32.mrf.mxu0  ;;  %1454 = vmatmul.mubr.bf16.gmra.mxu0 %v1193_v9 }
 0x181   : > { %v1110_v22 = vpop.f32.mrf.mxu1  ;;  %v1107_v23 = vadd.f32 %v1106_v11, %v994_v14  ;;  %v1169_v24 = vmax.f32 %v1105_v13, 0.0  ;;  %v998_v31 = vadd.f32 %v997_v21, %v2893_v20 }
 0x182   : > { %v999_v25 = vpop.f32.mrf.mxu0 }
 0x183   : > { %v1112_v26 = vpop.f32.mrf.mxu1  ;;  %v1170_v28 = vmax.f32 %v1107_v23, 0.0  ;;  %v1000_v29 = vadd.f32 %v999_v25, %v2889_v19  ;;  %v1195_v36 = vpack.c.bf16 %v1169_v24, %v1167_v30  ;;  %v1111_v42 = vadd.f32 %v1110_v22, %v998_v31 }
 0x184   : > { %v1001_v32 = vpop.f32.mrf.mxu0 }
 0x185   : > { %v1114_v33 = vpop.f32.mrf.mxu1  ;;  %v1196_v34 = vpack.c.bf16 %v1170_v28, %v1168_v27  ;;  %v1002_v35 = vadd.f32 %v1001_v32, %v2893_v20  ;;  %v1113_v39 = vadd.f32 %v1112_v26, %v1000_v29  ;;  %v1171_v52 = vmax.f32 %v1111_v42, 0.0 }
 0x186   : > { %v1003_v37 = vpop.f32.mrf.mxu0 }
 0x187   : > { %v1116_v38 = vpop.f32.mrf.mxu1  ;;  %v1115_v40 = vadd.f32 %v1114_v33, %v1002_v35  ;;  %v1004_v41 = vadd.f32 %v1003_v37, %v2889_v19  ;;  %1463 = vmatprep.mubr.bf16.mxu0 %v1196_v34  ;;  %v1172_v49 = vmax.f32 %v1113_v39, 0.0 }
 0x188   : > { %v1007_v43 = vpop.f32.mrf.mxu0  ;;  %1464 = vmatmul.mubr.bf16.gmra.mxu0 %v1195_v36 }
 0x189   : > { %v1120_v44 = vpop.f32.mrf.mxu1  ;;  %v1117_v45 = vadd.f32 %v1116_v38, %v1004_v41  ;;  %v1173_v46 = vmax.f32 %v1115_v40, 0.0  ;;  %v1008_v53 = vadd.f32 %v1007_v43, %v2893_v20 }
 0x18a   : > { %v1009_v47 = vpop.f32.mrf.mxu0 }
 0x18b   : > { %v1122_v48 = vpop.f32.mrf.mxu1  ;;  %v1174_v50 = vmax.f32 %v1117_v45, 0.0  ;;  %v1010_v51 = vadd.f32 %v1009_v47, %v2889_v19  ;;  %v1197_v58 = vpack.c.bf16 %v1173_v46, %v1171_v52  ;;  %v1121_v0 = vadd.f32 %v1120_v44, %v1008_v53 }
 0x18c   : > { %v1011_v54 = vpop.f32.mrf.mxu0 }
 0x18d   : > { %v1124_v55 = vpop.f32.mrf.mxu1  ;;  %v1198_v56 = vpack.c.bf16 %v1174_v50, %v1172_v49  ;;  %v1012_v57 = vadd.f32 %v1011_v54, %v2893_v20  ;;  %v1123_v61 = vadd.f32 %v1122_v48, %v1010_v51  ;;  %v1175_v10 = vmax.f32 %v1121_v0, 0.0 }
 0x18e   : > { %v1013_v59 = vpop.f32.mrf.mxu0 }
 0x18f   : > { %v1126_v60 = vpop.f32.mrf.mxu1  ;;  %v1125_v62 = vadd.f32 %v1124_v55, %v1012_v57  ;;  %v1014_v63 = vadd.f32 %v1013_v59, %v2889_v19  ;;  %1473 = vmatprep.mubr.bf16.mxu0 %v1198_v56  ;;  %v1176_v7 = vmax.f32 %v1123_v61, 0.0 }
 0x190   : > { %v1017_v1 = vpop.f32.mrf.mxu0  ;;  %1474 = vmatmul.mubr.bf16.gmra.mxu0 %v1197_v58 }
 0x191   : > { %v1130_v2 = vpop.f32.mrf.mxu1  ;;  %v1127_v3 = vadd.f32 %v1126_v60, %v1014_v63  ;;  %v1177_v4 = vmax.f32 %v1125_v62, 0.0  ;;  %v1018_v11 = vadd.f32 %v1017_v1, %v2893_v20 }
 0x192   : > { %v1019_v5 = vpop.f32.mrf.mxu0 }
 0x193   : > { %v1132_v6 = vpop.f32.mrf.mxu1  ;;  %v1178_v8 = vmax.f32 %v1127_v3, 0.0  ;;  %v1020_v9 = vadd.f32 %v1019_v5, %v2889_v19  ;;  %v1199_v21 = vpack.c.bf16 %v1177_v4, %v1175_v10  ;;  %v1131_v27 = vadd.f32 %v1130_v2, %v1018_v11 }
 0x194   : > { %v1021_v12 = vpop.f32.mrf.mxu0 }
 0x195   : > { %v1134_v13 = vpop.f32.mrf.mxu1  ;;  %v1200_v14 = vpack.c.bf16 %v1178_v8, %v1176_v7  ;;  %v1022_v18 = vadd.f32 %v1021_v12, %v2893_v20  ;;  %v1133_v24 = vadd.f32 %v1132_v6, %v1020_v9  ;;  %v1179_v37 = vmax.f32 %v1131_v27, 0.0 }
 0x196   : > { %v1023_v22 = vpop.f32.mrf.mxu0 }
 0x197   : > { %v1136_v23 = vpop.f32.mrf.mxu1  ;;  %v1135_v25 = vadd.f32 %v1134_v13, %v1022_v18  ;;  %v1024_v26 = vadd.f32 %v1023_v22, %v2889_v19  ;;  %1483 = vmatprep.mubr.bf16.mxu0 %v1200_v14  ;;  %v1180_v34 = vmax.f32 %v1133_v24, 0.0  ;;  %v2461_v18 = vld [vmem:[#allocation8] sm:$0xff]  }
 0x198   : > { %v1027_v28 = vpop.f32.mrf.mxu0  ;;  %1484 = vmatmul.mubr.bf16.gmra.mxu0 %v1199_v21 }
 0x199   : > { %v1140_v29 = vpop.f32.mrf.mxu1  ;;  %v1137_v30 = vadd.f32 %v1136_v23, %v1024_v26  ;;  %v1181_v31 = vmax.f32 %v1135_v25, 0.0  ;;  %v1028_v38 = vadd.f32 %v1027_v28, %v2893_v20 }
 0x19a   : > { %v1029_v32 = vpop.f32.mrf.mxu0 }
 0x19b   : > { %v1142_v33 = vpop.f32.mrf.mxu1  ;;  %v1182_v35 = vmax.f32 %v1137_v30, 0.0  ;;  %v1030_v36 = vadd.f32 %v1029_v32, %v2889_v19  ;;  %v1201_v43 = vpack.c.bf16 %v1181_v31, %v1179_v37  ;;  %v1141_v49 = vadd.f32 %v1140_v29, %v1028_v38 }
 0x19c   : > { %v1031_v39 = vpop.f32.mrf.mxu0 }
 0x19d   : > { %v1144_v40 = vpop.f32.mrf.mxu1  ;;  %v1202_v41 = vpack.c.bf16 %v1182_v35, %v1180_v34  ;;  %v1032_v42 = vadd.f32 %v1031_v39, %v2893_v20  ;;  %v1143_v46 = vadd.f32 %v1142_v33, %v1030_v36  ;;  %v1183_v59 = vmax.f32 %v1141_v49, 0.0 }
 0x19e   : > { %v1033_v44 = vpop.f32.mrf.mxu0 }
 0x19f   : > { %v1146_v45 = vpop.f32.mrf.mxu1  ;;  %v1145_v47 = vadd.f32 %v1144_v40, %v1032_v42  ;;  %v1034_v48 = vadd.f32 %v1033_v44, %v2889_v19  ;;  %1493 = vmatprep.mubr.bf16.mxu0 %v1202_v41  ;;  %v1184_v56 = vmax.f32 %v1143_v46, 0.0 }
 0x1a0   : > { %v1037_v50 = vpop.f32.mrf.mxu0  ;;  %1494 = vmatmul.mubr.bf16.gmra.mxu0 %v1201_v43 }
 0x1a1   : > { %v1150_v51 = vpop.f32.mrf.mxu1  ;;  %v1147_v52 = vadd.f32 %v1146_v45, %v1034_v48  ;;  %v1185_v53 = vmax.f32 %v1145_v47, 0.0  ;;  %v1038_v60 = vadd.f32 %v1037_v50, %v2893_v20 }
 0x1a2   : > { %v1039_v54 = vpop.f32.mrf.mxu0 }
 0x1a3   : > { %v1152_v55 = vpop.f32.mrf.mxu1  ;;  %v1186_v57 = vmax.f32 %v1147_v52, 0.0  ;;  %v1040_v58 = vadd.f32 %v1039_v54, %v2889_v19  ;;  %v1203_v1 = vpack.c.bf16 %v1185_v53, %v1183_v59  ;;  %v1151_v6 = vadd.f32 %v1150_v51, %v1038_v60 }
 0x1a4   : > { %v1041_v61 = vpop.f32.mrf.mxu0 }
 0x1a5   : > { %v1154_v62 = vpop.f32.mrf.mxu1  ;;  %v1204_v63 = vpack.c.bf16 %v1186_v57, %v1184_v56  ;;  %v1042_v0 = vadd.f32 %v1041_v61, %v2893_v20  ;;  %v1153_v3 = vadd.f32 %v1152_v55, %v1040_v58  ;;  %v1187_v12 = vmax.f32 %v1151_v6, 0.0  ;;  %v2460_v20 = vld [vmem:[#allocation8 + $0x40] sm:$0xff]  }
 0x1a6   : > { %v1043_v2 = vpop.f32.mrf.mxu0  ;;  %2119 = vmatprep.subr.bf16.mxu1 %v2460_v20 }
 0x1a7   : > { %v1155_v4 = vadd.f32 %v1154_v62, %v1042_v0  ;;  %v1044_v5 = vadd.f32 %v1043_v2, %v2889_v19  ;;  %1503 = vmatprep.mubr.bf16.mxu0 %v1204_v63  ;;  %v1156_v7 = vpop.f32.mrf.mxu1  ;;  %v1188_v10 = vmax.f32 %v1153_v3, 0.0  ;;  %2120 = vmatpush3.bf16.msra.mxu1 %v2461_v18  ;;  %v1239_v19 = vld [vmem:[%s3064_s4] sm:$0x3] }
 0x1a8   : > { %1504 = vmatmul.mubr.bf16.gmra.mxu0 %v1203_v1  ;;  %v2932_v22 = vrot.slane %v1239_v19, %v449_v16  ;;  %v2936_v23 = vrot.slane %v1239_v19, %v445_v17 }
 0x1a9   : > { %v1157_v8 = vadd.f32 %v1156_v7, %v1044_v5  ;;  %v1189_v9 = vmax.f32 %v1155_v4, 0.0 }
 0x1ab   : > { %v1190_v11 = vmax.f32 %v1157_v8, 0.0  ;;  %v1205_v14 = vpack.c.bf16 %v1189_v9, %v1187_v12 }
 0x1ad   : > { %v1206_v13 = vpack.c.bf16 %v1190_v11, %v1188_v10 }
 0x1af   : > { %1513 = vmatprep.mubr.bf16.mxu0 %v1206_v13 }
 0x1b0   : > { %1514 = vmatmul.mubr.bf16.gmra.mxu0 %v1205_v14 }
 0x238   : > { %v1445_v21 = vpop.f32.mrf.mxu0 }
 0x239   : > { %v1446_v28 = vadd.f32 %v1445_v21, %v2936_v23 }
 0x23a   : > { %v1447_v24 = vpop.f32.mrf.mxu0 }
 0x23b   : > { %v1448_v26 = vadd.f32 %v1447_v24, %v2932_v22  ;;  %v1524_v34 = vmax.f32 %v1446_v28, 0.0 }
 0x23c   : > { %v1449_v25 = vpop.f32.mrf.mxu0 }
 0x23d   : > { %v1450_v27 = vadd.f32 %v1449_v25, %v2936_v23  ;;  %v1525_v33 = vmax.f32 %v1448_v26, 0.0 }
 0x23e   : > { %v1451_v29 = vpop.f32.mrf.mxu0 }
 0x23f   : > { %v1452_v30 = vadd.f32 %v1451_v29, %v2932_v22  ;;  %v1526_v31 = vmax.f32 %v1450_v27, 0.0 }
 0x240   : > { %v1455_v32 = vpop.f32.mrf.mxu0 }
 0x241   : > { %v1527_v16 = vmax.f32 %v1452_v30, 0.0  ;;  %v1556_v17 = vpack.c.bf16 %v1526_v31, %v1524_v34  ;;  %v1456_v39 = vadd.f32 %v1455_v32, %v2936_v23 }
 0x242   : > { %v1457_v35 = vpop.f32.mrf.mxu0 }
 0x243   : > { %v1557_v15 = vpack.c.bf16 %v1527_v16, %v1525_v33  ;;  %v1458_v37 = vadd.f32 %v1457_v35, %v2932_v22  ;;  %v1528_v46 = vmax.f32 %v1456_v39, 0.0 }
 0x244   : > { %v1459_v36 = vpop.f32.mrf.mxu0 }
 0x245   : > { %v1460_v38 = vadd.f32 %v1459_v36, %v2936_v23  ;;  %1739 = vmatprep.mubr.bf16.mxu1 %v1557_v15  ;;  %v1529_v44 = vmax.f32 %v1458_v37, 0.0 }
 0x246   : > { %v1461_v40 = vpop.f32.mrf.mxu0  ;;  %1740 = vmatmul.mubr.bf16.vlgmr.msra.gmra.mxu1 %v1556_v17 }
 0x247   : > { %v1462_v41 = vadd.f32 %v1461_v40, %v2932_v22  ;;  %v1530_v42 = vmax.f32 %v1460_v38, 0.0 }
 0x248   : > { %v1465_v43 = vpop.f32.mrf.mxu0 }
 0x249   : > { %v1531_v45 = vmax.f32 %v1462_v41, 0.0  ;;  %v1558_v49 = vpack.c.bf16 %v1530_v42, %v1528_v46  ;;  %v1466_v53 = vadd.f32 %v1465_v43, %v2936_v23 }
 0x24a   : > { %v1467_v47 = vpop.f32.mrf.mxu0 }
 0x24b   : > { %v1559_v48 = vpack.c.bf16 %v1531_v45, %v1529_v44  ;;  %v1468_v51 = vadd.f32 %v1467_v47, %v2932_v22  ;;  %v1532_v60 = vmax.f32 %v1466_v53, 0.0 }
 0x24c   : > { %v1469_v50 = vpop.f32.mrf.mxu0 }
 0x24d   : > { %v1470_v52 = vadd.f32 %v1469_v50, %v2936_v23  ;;  %1747 = vmatprep.mubr.bf16.mxu1 %v1559_v48  ;;  %v1533_v58 = vmax.f32 %v1468_v51, 0.0 }
 0x24e   : > { %v1471_v54 = vpop.f32.mrf.mxu0  ;;  %1748 = vmatmul.mubr.bf16.gmra.mxu1 %v1558_v49 }
 0x24f   : > { %v1472_v55 = vadd.f32 %v1471_v54, %v2932_v22  ;;  %v1534_v56 = vmax.f32 %v1470_v52, 0.0 }
 0x250   : > { %v1475_v57 = vpop.f32.mrf.mxu0 }
 0x251   : > { %v1535_v59 = vmax.f32 %v1472_v55, 0.0  ;;  %v1560_v63 = vpack.c.bf16 %v1534_v56, %v1532_v60  ;;  %v1476_v3 = vadd.f32 %v1475_v57, %v2936_v23 }
 0x252   : > { %v1477_v61 = vpop.f32.mrf.mxu0 }
 0x253   : > { %v1561_v62 = vpack.c.bf16 %v1535_v59, %v1533_v58  ;;  %v1478_v1 = vadd.f32 %v1477_v61, %v2932_v22  ;;  %v1536_v10 = vmax.f32 %v1476_v3, 0.0 }
 0x254   : > { %v1479_v0 = vpop.f32.mrf.mxu0 }
 0x255   : > { %v1480_v2 = vadd.f32 %v1479_v0, %v2936_v23  ;;  %1755 = vmatprep.mubr.bf16.mxu1 %v1561_v62  ;;  %v1537_v8 = vmax.f32 %v1478_v1, 0.0 }
 0x256   : > { %v1481_v4 = vpop.f32.mrf.mxu0  ;;  %1756 = vmatmul.mubr.bf16.gmra.mxu1 %v1560_v63 }
 0x257   : > { %v1482_v5 = vadd.f32 %v1481_v4, %v2932_v22  ;;  %v1538_v6 = vmax.f32 %v1480_v2, 0.0 }
 0x258   : > { %v1485_v7 = vpop.f32.mrf.mxu0 }
 0x259   : > { %v1539_v9 = vmax.f32 %v1482_v5, 0.0  ;;  %v1562_v13 = vpack.c.bf16 %v1538_v6, %v1536_v10  ;;  %v1486_v19 = vadd.f32 %v1485_v7, %v2936_v23  ;;  %v2974_v7 = vld [vmem:[%s3066_s6] ss:$0 sm:$0xff] }
 0x25a   : > { %v1487_v11 = vpop.f32.mrf.mxu0 }
 0x25b   : > { %v1563_v12 = vpack.c.bf16 %v1539_v9, %v1537_v8  ;;  %v1488_v20 = vadd.f32 %v1487_v11, %v2932_v22  ;;  %v1540_v29 = vmax.f32 %v1486_v19, 0.0 }
 0x25c   : > { %v1489_v14 = vpop.f32.mrf.mxu0 }
 0x25d   : > { %v1490_v18 = vadd.f32 %v1489_v14, %v2936_v23  ;;  %1763 = vmatprep.mubr.bf16.mxu1 %v1563_v12  ;;  %v1541_v27 = vmax.f32 %v1488_v20, 0.0 }
 0x25e   : > { %v1491_v21 = vpop.f32.mrf.mxu0  ;;  %1764 = vmatmul.mubr.bf16.gmra.mxu1 %v1562_v13 }
 0x25f   : > { %v1492_v24 = vadd.f32 %v1491_v21, %v2932_v22  ;;  %v1542_v25 = vmax.f32 %v1490_v18, 0.0 }
 0x260   : > { %v1495_v26 = vpop.f32.mrf.mxu0 }
 0x261   : > { %v1543_v28 = vmax.f32 %v1492_v24, 0.0  ;;  %v1564_v32 = vpack.c.bf16 %v1542_v25, %v1540_v29  ;;  %v1496_v35 = vadd.f32 %v1495_v26, %v2936_v23 }
 0x262   : > { %v1497_v30 = vpop.f32.mrf.mxu0 }
 0x263   : > { %v1565_v31 = vpack.c.bf16 %v1543_v28, %v1541_v27  ;;  %v1498_v16 = vadd.f32 %v1497_v30, %v2932_v22  ;;  %v1544_v40 = vmax.f32 %v1496_v35, 0.0 }
 0x264   : > { %v1499_v33 = vpop.f32.mrf.mxu0 }
 0x265   : > { %v1500_v34 = vadd.f32 %v1499_v33, %v2936_v23  ;;  %1771 = vmatprep.mubr.bf16.mxu1 %v1565_v31  ;;  %v1545_v38 = vmax.f32 %v1498_v16, 0.0 }
 0x266   : > { %v1501_v15 = vpop.f32.mrf.mxu0  ;;  %1772 = vmatmul.mubr.bf16.gmra.mxu1 %v1564_v32 }
 0x267   : > { %v1502_v17 = vadd.f32 %v1501_v15, %v2932_v22  ;;  %v1546_v36 = vmax.f32 %v1500_v34, 0.0 }
 0x268   : > { %v1505_v37 = vpop.f32.mrf.mxu0 }
 0x269   : > { %v1547_v39 = vmax.f32 %v1502_v17, 0.0  ;;  %v1566_v43 = vpack.c.bf16 %v1546_v36, %v1544_v40  ;;  %v1506_v47 = vadd.f32 %v1505_v37, %v2936_v23 }
 0x26a   : > { %v1507_v41 = vpop.f32.mrf.mxu0 }
 0x26b   : > { %v1567_v42 = vpack.c.bf16 %v1547_v39, %v1545_v38  ;;  %v1508_v45 = vadd.f32 %v1507_v41, %v2932_v22  ;;  %v1548_v54 = vmax.f32 %v1506_v47, 0.0 }
 0x26c   : > { %v1509_v44 = vpop.f32.mrf.mxu0 }
 0x26d   : > { %v1510_v46 = vadd.f32 %v1509_v44, %v2936_v23  ;;  %1779 = vmatprep.mubr.bf16.mxu1 %v1567_v42  ;;  %v1549_v52 = vmax.f32 %v1508_v45, 0.0 }
 0x26e   : > { %v1511_v48 = vpop.f32.mrf.mxu0  ;;  %1780 = vmatmul.mubr.bf16.gmra.mxu1 %v1566_v43 }
 0x26f   : > { %v1512_v49 = vadd.f32 %v1511_v48, %v2932_v22  ;;  %v1550_v50 = vmax.f32 %v1510_v46, 0.0 }
 0x270   : > { %v1515_v51 = vpop.f32.mrf.mxu0 }
 0x271   : > { %v1551_v53 = vmax.f32 %v1512_v49, 0.0  ;;  %v1568_v57 = vpack.c.bf16 %v1550_v50, %v1548_v54  ;;  %v1516_v61 = vadd.f32 %v1515_v51, %v2936_v23 }
 0x272   : > { %v1517_v55 = vpop.f32.mrf.mxu0 }
 0x273   : > { %v1569_v56 = vpack.c.bf16 %v1551_v53, %v1549_v52  ;;  %v1518_v59 = vadd.f32 %v1517_v55, %v2932_v22  ;;  %v1552_v3 = vmax.f32 %v1516_v61, 0.0 }
 0x274   : > { %v1519_v58 = vpop.f32.mrf.mxu0 }
 0x275   : > { %v1520_v60 = vadd.f32 %v1519_v58, %v2936_v23  ;;  %1787 = vmatprep.mubr.bf16.mxu1 %v1569_v56  ;;  %v1553_v1 = vmax.f32 %v1518_v59, 0.0 }
 0x276   : > { %v1521_v62 = vpop.f32.mrf.mxu0  ;;  %1788 = vmatmul.mubr.bf16.gmra.mxu1 %v1568_v57 }
 0x277   : > { %v1522_v63 = vadd.f32 %v1521_v62, %v2932_v22  ;;  %v1554_v0 = vmax.f32 %v1520_v60, 0.0 }
 0x279   : > { %v1555_v2 = vmax.f32 %v1522_v63, 0.0  ;;  %v1570_v5 = vpack.c.bf16 %v1554_v0, %v1552_v3 }
 0x27b   : > { %v1571_v4 = vpack.c.bf16 %v1555_v2, %v1553_v1 }
 0x27d   : > { %1795 = vmatprep.mubr.bf16.mxu1 %v1571_v4 }
 0x27e   : > { %1796 = vmatmul.mubr.bf16.gmra.mxu1 %v1570_v5 }
 0x306   : > { %v2121_v6 = vpop.f32.mrf.mxu1 }
 0x308   : > { %v2122_v23 = vpop.f32.mrf.mxu1 }
 0x309   : > { %v2123_v8 = vadd.f32 %v2122_v23, %v2121_v6 }
 0x30a   : > { %v2124_v9 = vpop.f32.mrf.mxu1 }
 0x30b   : > { %v1742_v22 = vadd.f32 %v2123_v8, %v2974_v7 }
 0x30c   : > { %v2125_v10 = vpop.f32.mrf.mxu1 }
 0x30d   : > { %1804 = vst [vmem:[%s2977_s11] sm:$0xff] %v1742_v22  ;;  %v2126_v11 = vadd.f32 %v2125_v10, %v2124_v9 }
 0x30e   : > { %v2127_v12 = vpop.f32.mrf.mxu1 }
 0x30f   : > { %v1745_v13 = vadd.f32 %v2126_v11, %v2974_v7 }
 0x310   : > { %v2128_v14 = vpop.f32.mrf.mxu1 }
 0x311   : > { %1805 = vst [vmem:[%s2977_s11 + $0x8] sm:$0xff] %v1745_v13  ;;  %v2129_v20 = vadd.f32 %v2128_v14, %v2127_v12 }
 0x312   : > { %v2130_v18 = vpop.f32.mrf.mxu1 }
 0x313   : > { %v1750_v19 = vadd.f32 %v2129_v20, %v2974_v7 }
 0x314   : > { %v2131_v21 = vpop.f32.mrf.mxu1 }
 0x315   : > { %1806 = vst [vmem:[%s2977_s11 + $0x10] sm:$0xff] %v1750_v19  ;;  %v2132_v24 = vadd.f32 %v2131_v21, %v2130_v18 }
 0x316   : > { %v2133_v25 = vpop.f32.mrf.mxu1 }
 0x317   : > { %v1753_v26 = vadd.f32 %v2132_v24, %v2974_v7 }
 0x318   : > { %v2134_v27 = vpop.f32.mrf.mxu1 }
 0x319   : > { %1807 = vst [vmem:[%s2977_s11 + $0x18] sm:$0xff] %v1753_v26  ;;  %v2135_v28 = vadd.f32 %v2134_v27, %v2133_v25 }
 0x31a   : > { %v2136_v29 = vpop.f32.mrf.mxu1 }
 0x31b   : > { %v1758_v30 = vadd.f32 %v2135_v28, %v2974_v7 }
 0x31c   : > { %v2137_v31 = vpop.f32.mrf.mxu1 }
 0x31d   : > { %1808 = vst [vmem:[%s2977_s11 + $0x20] sm:$0xff] %v1758_v30  ;;  %v2138_v32 = vadd.f32 %v2137_v31, %v2136_v29 }
 0x31e   : > { %v2139_v33 = vpop.f32.mrf.mxu1 }
 0x31f   : > { %v1761_v16 = vadd.f32 %v2138_v32, %v2974_v7 }
 0x320   : > { %v2140_v34 = vpop.f32.mrf.mxu1 }
 0x321   : > { %1809 = vst [vmem:[%s2977_s11 + $0x28] sm:$0xff] %v1761_v16  ;;  %v2141_v35 = vadd.f32 %v2140_v34, %v2139_v33 }
 0x322   : > { %v2142_v15 = vpop.f32.mrf.mxu1 }
 0x323   : > { %v1766_v17 = vadd.f32 %v2141_v35, %v2974_v7 }
 0x324   : > { %v2143_v36 = vpop.f32.mrf.mxu1 }
 0x325   : > { %1810 = vst [vmem:[%s2977_s11 + $0x30] sm:$0xff] %v1766_v17  ;;  %v2144_v37 = vadd.f32 %v2143_v36, %v2142_v15 }
 0x326   : > { %v2145_v38 = vpop.f32.mrf.mxu1 }
 0x327   : > { %v1769_v39 = vadd.f32 %v2144_v37, %v2974_v7 }
 0x328   : > { %v2146_v40 = vpop.f32.mrf.mxu1 }
 0x329   : > { %1811 = vst [vmem:[%s2977_s11 + $0x38] sm:$0xff] %v1769_v39  ;;  %v2147_v41 = vadd.f32 %v2146_v40, %v2145_v38 }
 0x32a   : > { %v2148_v42 = vpop.f32.mrf.mxu1 }
 0x32b   : > { %v1774_v43 = vadd.f32 %v2147_v41, %v2974_v7 }
 0x32c   : > { %v2149_v44 = vpop.f32.mrf.mxu1 }
 0x32d   : > { %1812 = vst [vmem:[%s2977_s11 + $0x40] sm:$0xff] %v1774_v43  ;;  %v2150_v45 = vadd.f32 %v2149_v44, %v2148_v42 }
 0x32e   : > { %v2151_v46 = vpop.f32.mrf.mxu1 }
 0x32f   : > { %v1777_v47 = vadd.f32 %v2150_v45, %v2974_v7 }
 0x330   : > { %v2152_v48 = vpop.f32.mrf.mxu1 }
 0x331   : > { %1813 = vst [vmem:[%s2977_s11 + $0x48] sm:$0xff] %v1777_v47  ;;  %v2153_v49 = vadd.f32 %v2152_v48, %v2151_v46 }
 0x332   : > { %v2154_v50 = vpop.f32.mrf.mxu1 }
 0x333   : > { %v1782_v51 = vadd.f32 %v2153_v49, %v2974_v7 }
 0x334   : > { %v2155_v52 = vpop.f32.mrf.mxu1 }
 0x335   : > { %1814 = vst [vmem:[%s2977_s11 + $0x50] sm:$0xff] %v1782_v51  ;;  %v2156_v53 = vadd.f32 %v2155_v52, %v2154_v50 }
 0x336   : > { %v2157_v54 = vpop.f32.mrf.mxu1 }
 0x337   : > { %v1785_v55 = vadd.f32 %v2156_v53, %v2974_v7 }
 0x338   : > { %v2158_v56 = vpop.f32.mrf.mxu1 }
 0x339   : > { %1815 = vst [vmem:[%s2977_s11 + $0x58] sm:$0xff] %v1785_v55  ;;  %v2159_v57 = vadd.f32 %v2158_v56, %v2157_v54 }
 0x33a   : > { %v2160_v58 = vpop.f32.mrf.mxu1 }
 0x33b   : > { %v1790_v59 = vadd.f32 %v2159_v57, %v2974_v7 }
 0x33c   : > { %v2161_v60 = vpop.f32.mrf.mxu1 }
 0x33d   : > { %1816 = vst [vmem:[%s2977_s11 + $0x60] sm:$0xff] %v1790_v59  ;;  %v2162_v61 = vadd.f32 %v2161_v60, %v2160_v58 }
 0x33e   : > { %v2163_v62 = vpop.f32.mrf.mxu1 }
 0x33f   : > { %v1793_v63 = vadd.f32 %v2162_v61, %v2974_v7 }
 0x340   : > { %v2164_v0 = vpop.f32.mrf.mxu1 }
 0x341   : > { %1817 = vst [vmem:[%s2977_s11 + $0x68] sm:$0xff] %v1793_v63  ;;  %v2165_v1 = vadd.f32 %v2164_v0, %v2163_v62 }
 0x342   : > { %v2166_v2 = vpop.f32.mrf.mxu1 }
 0x343   : > { %v1798_v3 = vadd.f32 %v2165_v1, %v2974_v7 }
 0x344   : > { %v2167_v4 = vpop.f32.mrf.mxu1 }
 0x345   : > { %1818 = vst [vmem:[%s2977_s11 + $0x70] sm:$0xff] %v1798_v3  ;;  %v2168_v5 = vadd.f32 %v2167_v4, %v2166_v2 }
 0x347   : > { %v1801_v6 = vadd.f32 %v2168_v5, %v2974_v7 }
 0x349   : > { %1819 = vst [vmem:[%s2977_s11 + $0x78] sm:$0xff] %v1801_v6 }
 0x34a   : > { %2581 = shalt.err (!%p2578_p9)
}
 0x34b   : > { %s2582_s13 = scalar_lea.hbm %s3013_s23, 2048  ;;  %s2586_s12 = scalar_lea.hbm %s3067_s7, 4096 }
 0x34c   : > { %p2583_p1 = scmp.ne.s32.totalorder %s3013_s23, %s2582_s13  ;;  %p2587_p11 = scmp.lt.s32.totalorder %s3013_s23, %s3067_s7 }
 0x34d   : > { %p2588_p13 = scmp.lt.s32.totalorder %s2586_s12, %s2582_s13 }
 0x34e   : > { %p2584_p8 = pnand %p2583_p1, %p3087_p6 }
 0x34f   : > { %p2589_p2 = por %p2588_p13, %p2587_p11 }
 0x350   : > { %p2585_p10 = pneg %p2584_p8 }
 0x352   : > { %p2590_p4 = pnand %p2589_p2, %p2585_p10 }
 0x354   : > { %2593 = shalt.err (!%p2590_p4)
}
 0x355   : > { %s2653_s22 = smov 128   ;;  %s2654_s1 = smov 8  }
 0x356   : > { %2183 = dma.vmem_to_hbm [thread:$0]  (%p3087_p6), %s3015_s18, 2048, %s3013_s23, %s1821_s29, %s2653_s22, %s2653_s22, %s2654_s1  }
 0x357 PF: > { %s1849_s30 = sand.u32 1, %s2628_s24   ;;  %p3088_p12 = scmp.ne.s32.totalorder %s3074_s8, 0 }
 0x358   : > { %p3089_p0 = scmp.ge.s32.totalorder %s2640_s27, 2  ;;  %s1850_s28 = scalar_lea.sflag [#allocation4], %s1849_s30 }
 0x35a   : > { %p2200_p5 = pnand %p3089_p0, %p3088_p12 }
 0x35c   : > { %p2201_p3 = pneg %p2200_p5 }
 0x35e   : > { %2623 = dma.done.wait (%p2201_p3), %s1850_s28, 2048  }
 0x35f   : > { %2625 = vsyncadd (%p2201_p3), %s1850_s28, 4294965248  ;;  %p22_p7 = scmp.ge.s32.totalorder %s2775_s17, 4   ;;  %s3090_s24 = smov %s2632_s25 }
 0x360   : > { %s3091_s25 = smov %s2636_s26  ;;  %s3092_s26 = smov %s2785_s20 }
 0x361   : > { %s3093_s27 = smov %s2775_s17  ;;  %24 = sbr.rel (!%p22_p7) target bundleno = 9 (0x9), region = 105 }
 0x366   :  { %1855 = vsyncpa [#allocation3], 1 }
 0x367   :  { %1857 = vsyncpa [#allocation3 + $0x1], 1 }
 0x368   :  { %1858 = vsyncpa [#allocation6], 1 }
 0x369   :  { %1859 = vsyncpa [#allocation9], 1 }
 0x36a   :  { %1860 = vsyncpa [#allocation4], 1 }
 0x36b   :  { %1862 = vsyncpa [#allocation4 + $0x1], 1 }

</bundles_post_ra>
